<compile_context>
chip_gen: v7x
topology: tpu7x:2x2x1
jax: 0.10.0
libtpu: 0.0.40
codegen_flags: <defaults>
</compile_context>

<pallas_src>
import jax
import jax.numpy as jnp
from jax import lax
from jax.experimental import pallas as pl
from jax.experimental.pallas import tpu as pltpu


def _round_up(x, m):
    return (x + m - 1) // m * m


# ----------------------------- Kernel 1: STFT magnitude -----------------------------
def stft_mag_kernel(frames_ref, dft_ref, out_ref):
    # One MXU matmul against the combined (window-folded) cos|sin DFT matrix.
    y = jnp.dot(frames_ref[...], dft_ref[...], preferred_element_type=jnp.float32)
    f_pad = out_ref.shape[-1]
    re = y[:, :f_pad]          # aligned 128-lane halves (free views)
    im = y[:, f_pad:]
    out_ref[...] = jnp.sqrt(re * re + im * im)


def stft_magnitude(frames, dft, f_pad, tile_m):
    n_rows, win = frames.shape
    num_tiles = n_rows // tile_m
    return pl.pallas_call(
        stft_mag_kernel,
        out_shape=jax.ShapeDtypeStruct((n_rows, f_pad), jnp.float32),
        grid_spec=pltpu.PrefetchScalarGridSpec(
            num_scalar_prefetch=0,
            grid=(num_tiles,),
            in_specs=[
                pl.BlockSpec((tile_m, win), lambda i: (i, 0)),
                pl.BlockSpec((win, 2 * f_pad), lambda i: (0, 0)),
            ],
            out_specs=pl.BlockSpec((tile_m, f_pad), lambda i: (i, 0)),
        ),
        compiler_params=pltpu.CompilerParams(
            dimension_semantics=("parallel",)),   # shard frame tiles across TCs (v7x)
    )(frames, dft)


# --------------------- Kernel 2: GRU (in-kernel loop) + Linear + Softmax -------------
def gru_linear_softmax(spec, wih_p, whh_p, bih_p, bhh_p, wlin_p, blin_p, *, T, B_pad):
    n_pad, f_pad = spec.shape
    hp = whh_p.shape[0]
    hp3 = whh_p.shape[1]
    cp = wlin_p.shape[1]
    tb = T * B_pad

    def kernel(spec_ref, wih_ref, whh_ref, bih_ref, bhh_ref,
               wlin_ref, blin_ref, out_ref, gi_ref, hs_ref):
        # Hoisted input projection for ALL timesteps: one large MXU call.
        gi_ref[...] = (
            jnp.dot(spec_ref[pl.ds(0, tb), :], wih_ref[...],
                    preferred_element_type=jnp.float32)
            + bih_ref[...]
        )

        def step(t, h):
            row = pl.multiple_of(t * B_pad, B_pad)          # sublane-aligned offset
            gi = gi_ref[pl.ds(row, B_pad), :]               # [B_pad, 3*Hp]
            gh = (jnp.dot(h, whh_ref[...], preferred_element_type=jnp.float32)
                  + bhh_ref[...])
            # gates live at aligned 128-lane offsets 0 / Hp / 2*Hp -> free slices
            r = jax.nn.sigmoid(gi[:, 0:hp] + gh[:, 0:hp])
            z = jax.nn.sigmoid(gi[:, hp:2 * hp] + gh[:, hp:2 * hp])
            n = jnp.tanh(gi[:, 2 * hp:3 * hp] + r * gh[:, 2 * hp:3 * hp])
            h_new = (1.0 - z) * n + z * h
            hs_ref[pl.ds(row, B_pad), :] = h_new
            return h_new

        h0 = jnp.zeros((B_pad, hp), jnp.float32)
        lax.fori_loop(0, T, step, h0, unroll=(T <= 16))

        # Epilogue: one Linear + softmax over all (t, b) rows; padded class lanes
        # carry a -1e30 bias so they contribute exp(.) == 0. Lane-dense 128-wide store.
        logits = (jnp.dot(hs_ref[...], wlin_ref[...],
                          preferred_element_type=jnp.float32) + blin_ref[...])
        m = jnp.max(logits, axis=-1, keepdims=True)
        e = jnp.exp(logits - m)
        out_ref[...] = e * pl.reciprocal(jnp.sum(e, axis=-1, keepdims=True),
                                         approx=False)

    return pl.pallas_call(
        kernel,
        out_shape=jax.ShapeDtypeStruct((tb, cp), jnp.float32),
        grid_spec=pltpu.PrefetchScalarGridSpec(
            num_scalar_prefetch=0,
            grid=(1,),
            in_specs=[
                pl.BlockSpec((n_pad, f_pad), lambda i: (0, 0)),
                pl.BlockSpec((f_pad, hp3), lambda i: (0, 0)),
                pl.BlockSpec((hp, hp3), lambda i: (0, 0)),
                pl.BlockSpec((1, hp3), lambda i: (0, 0)),
                pl.BlockSpec((1, hp3), lambda i: (0, 0)),
                pl.BlockSpec((hp, cp), lambda i: (0, 0)),
                pl.BlockSpec((1, cp), lambda i: (0, 0)),
            ],
            out_specs=pl.BlockSpec((tb, cp), lambda i: (0, 0)),
            scratch_shapes=[
                pltpu.VMEM((tb, hp3), jnp.float32),   # input projection for all steps
                pltpu.VMEM((tb, hp), jnp.float32),    # h_t for all steps (epilogue)
            ],
        ),
        compiler_params=pltpu.CompilerParams(
            dimension_semantics=("arbitrary",)),      # true time recurrence
    )(spec, wih_p, whh_p, bih_p, bhh_p, wlin_p, blin_p)


# ------------------------------ Parameter packing ------------------------------------
def _pack_params(params, F, H, f_pad, hp, cp):
    W_ih, W_hh = params["W_ih"], params["W_hh"]          # [3H, F], [3H, H]
    b_ih, b_hh = params["b_ih"], params["b_hh"]          # [3H], [3H]
    W_lin, b_lin = params["W_lin"], params["b_lin"]      # [2, H], [2]

    wih_p = jnp.zeros((f_pad, 3 * hp), jnp.float32)
    whh_p = jnp.zeros((hp, 3 * hp), jnp.float32)
    bih_p = jnp.zeros((1, 3 * hp), jnp.float32)
    bhh_p = jnp.zeros((1, 3 * hp), jnp.float32)
    for g in range(3):                                   # gates at 128-lane offsets
        wih_p = wih_p.at[:F, g * hp:g * hp + H].set(W_ih[g * H:(g + 1) * H, :].T)
        whh_p = whh_p.at[:H, g * hp:g * hp + H].set(W_hh[g * H:(g + 1) * H, :].T)
        bih_p = bih_p.at[0, g * hp:g * hp + H].set(b_ih[g * H:(g + 1) * H])
        bhh_p = bhh_p.at[0, g * hp:g * hp + H].set(b_hh[g * H:(g + 1) * H])

    wlin_p = jnp.zeros((hp, cp), jnp.float32).at[:H, :2].set(W_lin.T)
    blin_p = jnp.full((1, cp), -1e30, jnp.float32).at[0, :2].set(b_lin)
    return wih_p, whh_p, bih_p, bhh_p, wlin_p, blin_p


# --------------------------------- Full forward --------------------------------------
def vad_forward(x, params, n_fft, win_len, hop_len):
    B, S = x.shape
    T = (S - win_len) // hop_len + 1
    F = n_fft // 2 + 1
    H = F // 2

    f_pad = _round_up(F, 128)
    hp = _round_up(H, 128)
    cp = 128
    B_pad = _round_up(B, 8)

    # Frame-row tiling for the parallel STFT kernel (keeps tiles VMEM-bounded on v7x).
    t_chunk = max(1, min(T, 1024 // B_pad))
    T_pad = _round_up(T, t_chunk)
    n_pad = T_pad * B_pad
    tile_m = t_chunk * B_pad

    # ---- framing (time-major rows: row = t*B_pad + b) ----
    # TODO(synk): do the framing inside the STFT kernel via an element-offset
    # index_map / strided DMA on the raw waveform to avoid materializing the
    # overlapping-frames array in HBM.
    idx = hop_len * jnp.arange(T)[:, None] + jnp.arange(win_len)[None, :]    # [T, win]
    frames_tbw = jnp.transpose(x[:, idx], (1, 0, 2)).astype(jnp.float32)     # [T, B, win]
    frames = jnp.zeros((T_pad, B_pad, win_len), jnp.float32)
    frames = frames.at[:T, :B, :].set(frames_tbw).reshape(n_pad, win_len)

    # ---- window-folded real-DFT matrix, cos|sin concatenated, F padded to 128 ----
    n = jnp.arange(win_len, dtype=jnp.float32)
    window = 0.5 - 0.5 * jnp.cos(2.0 * jnp.pi * n / win_len)                 # periodic Hann
    k = jnp.arange(F, dtype=jnp.float32)
    ang = 2.0 * jnp.pi * n[:, None] * k[None, :] / n_fft                     # [win, F]
    dft = jnp.zeros((win_len, 2 * f_pad), jnp.float32)
    dft = dft.at[:, :F].set(window[:, None] * jnp.cos(ang))
    dft = dft.at[:, f_pad:f_pad + F].set(-window[:, None] * jnp.sin(ang))

    spec = stft_magnitude(frames, dft, f_pad, tile_m)                        # [n_pad, f_pad]

    packed = _pack_params(params, F, H, f_pad, hp, cp)
    probs = gru_linear_softmax(spec, *packed, T=T, B_pad=B_pad)              # [T*B_pad, 128]

    out = probs.reshape(T, B_pad, cp)[:, :B, :2]                             # [T, B, 2]
    # .squeeze(1) in PyTorch is a no-op for T > 1
    return jnp.transpose(out, (1, 0, 2))                                     # [B, T, 2]


vad_forward_jit = jax.jit(vad_forward, static_argnums=(2, 3, 4))


# ------------------------------- Pure-JAX reference ----------------------------------
def vad_reference(x, params, n_fft, win_len, hop_len):
    B, S = x.shape
    T = (S - win_len) // hop_len + 1
    idx = hop_len * jnp.arange(T)[:, None] + jnp.arange(win_len)[None, :]
    n = jnp.arange(win_len, dtype=jnp.float32)
    window = 0.5 - 0.5 * jnp.cos(2.0 * jnp.pi * n / win_len)
    frames = x[:, idx] * window                                              # [B, T, win]
    mag = jnp.abs(jnp.fft.rfft(frames, n=n_fft, axis=-1)).astype(jnp.float32)  # [B, T, F]

    W_ih, W_hh = params["W_ih"], params["W_hh"]
    b_ih, b_hh = params["b_ih"], params["b_hh"]
    H = W_hh.shape[1]

    def step(h, xt):
        gi = xt @ W_ih.T + b_ih
        gh = h @ W_hh.T + b_hh
        r = jax.nn.sigmoid(gi[:, :H] + gh[:, :H])
        z = jax.nn.sigmoid(gi[:, H:2 * H] + gh[:, H:2 * H])
        nn_ = jnp.tanh(gi[:, 2 * H:] + r * gh[:, 2 * H:])
        h_new = (1.0 - z) * nn_ + z * h
        return h_new, h_new

    _, hs = lax.scan(step, jnp.zeros((B, H), jnp.float32), jnp.swapaxes(mag, 0, 1))
    logits = hs @ params["W_lin"].T + params["b_lin"]                        # [T, B, 2]
    probs = jax.nn.softmax(logits, axis=-1)
    return jnp.transpose(probs, (1, 0, 2))


if __name__ == "__main__":
    # small config consistent with the module: n_fft=16 -> input_size=9, hidden=4
    n_fft, win_len, hop_len = 16, 16, 8
    hidden_size = 32          # stored on the module but unused in forward
    F = n_fft // 2 + 1        # 9
    H = F // 2                # 4
    B = 2
    T = 8
    S = win_len + (T - 1) * hop_len   # 72

    key = jax.random.PRNGKey(0)
    kx, k1, k2, k3, k4, k5, k6 = jax.random.split(key, 7)
    x = jax.random.normal(kx, (B, S), dtype=jnp.float32)

    params = {
        "W_ih":  0.1 * jax.random.normal(k1, (3 * H, F), jnp.float32),
        "W_hh":  0.1 * jax.random.normal(k2, (3 * H, H), jnp.float32),
        "b_ih":  0.1 * jax.random.normal(k3, (3 * H,), jnp.float32),
        "b_hh":  0.1 * jax.random.normal(k4, (3 * H,), jnp.float32),
        "W_lin": 0.1 * jax.random.normal(k5, (2, H), jnp.float32),
        "b_lin": 0.1 * jax.random.normal(k6, (2,), jnp.float32),
    }

    out = vad_forward_jit(x, params, n_fft, win_len, hop_len)
    out = jax.block_until_ready(out)

    ref = vad_reference(x, params, n_fft, win_len, hop_len)
    assert out.shape == (B, T, 2), out.shape
    assert jnp.allclose(out, ref, atol=1e-4, rtol=1e-4), float(jnp.max(jnp.abs(out - ref)))

    print("KERNEL_OK")
</pallas_src>

<mosaic_0001>
module attributes {stable_mosaic.version = 11 : i64} {
  func.func @stft_mag_kernel(%arg0: i32, %arg1: memref<64x16xf32, #tpu.memory_space<vmem>>, %arg2: memref<16x256xf32, #tpu.memory_space<vmem>>, %arg3: memref<64x128xf32, #tpu.memory_space<vmem>>) attributes {dimension_semantics = [#tpu.dimension_semantics<parallel>], iteration_bounds = array<i64: 1>, scalar_prefetch = 0 : i64, scratch_operands = 0 : i64, tpu.core_type = #tpu.core_type<tc>, window_params = [{transform_indices = @transform_0, window_bounds = array<i64: 64, 16>}, {pipeline_mode = #tpu.pipeline_mode<synchronous>, transform_indices = @transform_1, window_bounds = array<i64: 16, 256>}, {transform_indices = @transform_2, window_bounds = array<i64: 64, 128>}]} {
    %c0 = arith.constant 0 : index
    %c0_0 = arith.constant 0 : index
    %0 = vector.load %arg1[%c0, %c0_0] : memref<64x16xf32, #tpu.memory_space<vmem>>, vector<64x16xf32>
    %c0_1 = arith.constant 0 : index
    %c0_2 = arith.constant 0 : index
    %1 = vector.load %arg2[%c0_1, %c0_2] : memref<16x256xf32, #tpu.memory_space<vmem>>, vector<16x256xf32>
    %cst = arith.constant dense<0.000000e+00> : vector<64x256xf32>
    %2 = tpu.matmul %0, %1, %cst {dimension_numbers = #tpu.dot_dimension_numbers<[1], [0], [0], [1], [0, 0, 1, 1], [], []>} : vector<64x16xf32>, vector<16x256xf32>, vector<64x256xf32> -> vector<64x256xf32>
    %3 = vector.extract_strided_slice %2 {offsets = [0, 0], sizes = [64, 128], strides = [1, 1]} : vector<64x256xf32> to vector<64x128xf32>
    %4 = vector.extract_strided_slice %2 {offsets = [0, 128], sizes = [64, 128], strides = [1, 1]} : vector<64x256xf32> to vector<64x128xf32>
    %5 = arith.mulf %3, %3 : vector<64x128xf32>
    %6 = arith.mulf %4, %4 : vector<64x128xf32>
    %7 = arith.addf %5, %6 : vector<64x128xf32>
    %8 = math.sqrt %7 : vector<64x128xf32>
    %c0_3 = arith.constant 0 : index
    %c0_4 = arith.constant 0 : index
    %9 = vector.load %arg3[%c0_3, %c0_4] : memref<64x128xf32, #tpu.memory_space<vmem>>, vector<64x128xf32>
    tpu.vector_store %arg3[%c0_3, %c0_4], %8 {strides = array<i32>} : memref<64x128xf32, #tpu.memory_space<vmem>>, vector<64x128xf32>,
    return
  }
  func.func @transform_0(%arg0: i32) -> (i32, i32) {
    %c0_i32 = arith.constant 0 : i32
    %c0_i32_0 = arith.constant 0 : i32
    return %arg0, %c0_i32 : i32, i32
  }
  func.func @transform_1(%arg0: i32) -> (i32, i32) {
    %c0_i32 = arith.constant 0 : i32
    %c0_i32_0 = arith.constant 0 : i32
    %c0_i32_1 = arith.constant 0 : i32
    return %c0_i32, %c0_i32_0 : i32, i32
  }
  func.func @transform_2(%arg0: i32) -> (i32, i32) {
    %c0_i32 = arith.constant 0 : i32
    %c0_i32_0 = arith.constant 0 : i32
    return %arg0, %c0_i32 : i32, i32
  }
}

module attributes {stable_mosaic.version = 11 : i64} {
  func.func @kernel(%arg0: i32, %arg1: memref<64x128xf32, #tpu.memory_space<vmem>>, %arg2: memref<128x384xf32, #tpu.memory_space<vmem>>, %arg3: memref<128x384xf32, #tpu.memory_space<vmem>>, %arg4: memref<1x384xf32, #tpu.memory_space<vmem>>, %arg5: memref<1x384xf32, #tpu.memory_space<vmem>>, %arg6: memref<128x128xf32, #tpu.memory_space<vmem>>, %arg7: memref<1x128xf32, #tpu.memory_space<vmem>>, %arg8: memref<64x128xf32, #tpu.memory_space<vmem>>, %arg9: memref<64x384xf32, #tpu.memory_space<vmem>>, %arg10: memref<64x128xf32, #tpu.memory_space<vmem>>) attributes {dimension_semantics = [#tpu.dimension_semantics<arbitrary>], iteration_bounds = array<i64: 1>, scalar_prefetch = 0 : i64, scratch_operands = 2 : i64, tpu.core_type = #tpu.core_type<tc>, window_params = [{pipeline_mode = #tpu.pipeline_mode<synchronous>, transform_indices = @transform_0, window_bounds = array<i64: 64, 128>}, {pipeline_mode = #tpu.pipeline_mode<synchronous>, transform_indices = @transform_1, window_bounds = array<i64: 128, 384>}, {pipeline_mode = #tpu.pipeline_mode<synchronous>, transform_indices = @transform_2, window_bounds = array<i64: 128, 384>}, {pipeline_mode = #tpu.pipeline_mode<synchronous>, transform_indices = @transform_3, window_bounds = array<i64: 1, 384>}, {pipeline_mode = #tpu.pipeline_mode<synchronous>, transform_indices = @transform_4, window_bounds = array<i64: 1, 384>}, {pipeline_mode = #tpu.pipeline_mode<synchronous>, transform_indices = @transform_5, window_bounds = array<i64: 128, 128>}, {pipeline_mode = #tpu.pipeline_mode<synchronous>, transform_indices = @transform_6, window_bounds = array<i64: 1, 128>}, {pipeline_mode = #tpu.pipeline_mode<synchronous>, transform_indices = @transform_7, window_bounds = array<i64: 64, 128>}]} {
    %c0 = arith.constant 0 : index
    %c0_0 = arith.constant 0 : index
    %0 = vector.load %arg1[%c0, %c0_0] : memref<64x128xf32, #tpu.memory_space<vmem>>, vector<64x128xf32>
    %c0_1 = arith.constant 0 : index
    %c0_2 = arith.constant 0 : index
    %1 = vector.load %arg2[%c0_1, %c0_2] : memref<128x384xf32, #tpu.memory_space<vmem>>, vector<128x384xf32>
    %cst = arith.constant dense<0.000000e+00> : vector<64x384xf32>
    %2 = tpu.matmul %0, %1, %cst {dimension_numbers = #tpu.dot_dimension_numbers<[1], [0], [0], [1], [0, 0, 1, 1], [], []>} : vector<64x128xf32>, vector<128x384xf32>, vector<64x384xf32> -> vector<64x384xf32>
    %c0_3 = arith.constant 0 : index
    %c0_4 = arith.constant 0 : index
    %3 = vector.load %arg4[%c0_3, %c0_4] : memref<1x384xf32, #tpu.memory_space<vmem>>, vector<1x384xf32>
    %4 = vector.broadcast %3 : vector<1x384xf32> to vector<64x384xf32>
    %5 = arith.addf %2, %4 : vector<64x384xf32>
    %c0_5 = arith.constant 0 : index
    %c0_6 = arith.constant 0 : index
    %6 = vector.load %arg9[%c0_5, %c0_6] : memref<64x384xf32, #tpu.memory_space<vmem>>, vector<64x384xf32>
    tpu.vector_store %arg9[%c0_5, %c0_6], %5 {strides = array<i32>} : memref<64x384xf32, #tpu.memory_space<vmem>>, vector<64x384xf32>,
    %cst_7 = arith.constant 0.000000e+00 : f32
    %7 = vector.broadcast %cst_7 : f32 to vector<8x128xf32>
    %c0_i32 = arith.constant 0 : i32
    %c8_i32 = arith.constant 8 : i32
    %8 = arith.muli %c0_i32, %c8_i32 : i32
    %9 = tpu.assume_multiple %8, 8 : i32
    %10 = arith.index_cast %9 : i32 to index
    %c0_8 = arith.constant 0 : index
    %11 = vector.load %arg9[%10, %c0_8] : memref<64x384xf32, #tpu.memory_space<vmem>>, vector<8x384xf32>
    %c0_9 = arith.constant 0 : index
    %c0_10 = arith.constant 0 : index
    %12 = vector.load %arg3[%c0_9, %c0_10] : memref<128x384xf32, #tpu.memory_space<vmem>>, vector<128x384xf32>
    %cst_11 = arith.constant dense<0.000000e+00> : vector<8x384xf32>
    %13 = tpu.matmul %7, %12, %cst_11 {dimension_numbers = #tpu.dot_dimension_numbers<[1], [0], [0], [1], [0, 0, 1, 1], [], []>} : vector<8x128xf32>, vector<128x384xf32>, vector<8x384xf32> -> vector<8x384xf32>
    %c0_12 = arith.constant 0 : index
    %c0_13 = arith.constant 0 : index
    %14 = vector.load %arg5[%c0_12, %c0_13] : memref<1x384xf32, #tpu.memory_space<vmem>>, vector<1x384xf32>
    %15 = vector.broadcast %14 : vector<1x384xf32> to vector<8x384xf32>
    %16 = arith.addf %13, %15 : vector<8x384xf32>
    %17 = vector.extract_strided_slice %11 {offsets = [0, 0], sizes = [8, 128], strides = [1, 1]} : vector<8x384xf32> to vector<8x128xf32>
    %18 = vector.extract_strided_slice %16 {offsets = [0, 0], sizes = [8, 128], strides = [1, 1]} : vector<8x384xf32> to vector<8x128xf32>
    %19 = arith.addf %17, %18 : vector<8x128xf32>
    %20 = arith.negf %19 : vector<8x128xf32>
    %21 = math.exp %20 : vector<8x128xf32>
    %cst_14 = arith.constant 1.000000e+00 : f32
    %22 = vector.broadcast %cst_14 : f32 to vector<8x128xf32>
    %23 = arith.addf %22, %21 : vector<8x128xf32>
    %24 = arith.divf %22, %23 : vector<8x128xf32>
    %25 = vector.extract_strided_slice %11 {offsets = [0, 128], sizes = [8, 128], strides = [1, 1]} : vector<8x384xf32> to vector<8x128xf32>
    %26 = vector.extract_strided_slice %16 {offsets = [0, 128], sizes = [8, 128], strides = [1, 1]} : vector<8x384xf32> to vector<8x128xf32>
    %27 = arith.addf %25, %26 : vector<8x128xf32>
    %28 = arith.negf %27 : vector<8x128xf32>
    %29 = math.exp %28 : vector<8x128xf32>
    %cst_15 = arith.constant 1.000000e+00 : f32
    %30 = vector.broadcast %cst_15 : f32 to vector<8x128xf32>
    %31 = arith.addf %30, %29 : vector<8x128xf32>
    %32 = arith.divf %30, %31 : vector<8x128xf32>
    %33 = vector.extract_strided_slice %11 {offsets = [0, 256], sizes = [8, 128], strides = [1, 1]} : vector<8x384xf32> to vector<8x128xf32>
    %34 = vector.extract_strided_slice %16 {offsets = [0, 256], sizes = [8, 128], strides = [1, 1]} : vector<8x384xf32> to vector<8x128xf32>
    %35 = arith.mulf %24, %34 : vector<8x128xf32>
    %36 = arith.addf %33, %35 : vector<8x128xf32>
    %37 = math.tanh %36 : vector<8x128xf32>
    %cst_16 = arith.constant 1.000000e+00 : f32
    %38 = vector.broadcast %cst_16 : f32 to vector<8x128xf32>
    %39 = arith.subf %38, %32 : vector<8x128xf32>
    %40 = arith.mulf %39, %37 : vector<8x128xf32>
    %41 = arith.mulf %32, %7 : vector<8x128xf32>
    %42 = arith.addf %40, %41 : vector<8x128xf32>
    %43 = arith.index_cast %9 : i32 to index
    %c0_17 = arith.constant 0 : index
    %44 = vector.load %arg10[%43, %c0_17] : memref<64x128xf32, #tpu.memory_space<vmem>>, vector<8x128xf32>
    tpu.vector_store %arg10[%43, %c0_17], %42 {strides = array<i32>} : memref<64x128xf32, #tpu.memory_space<vmem>>, vector<8x128xf32>,
    %c1_i32 = arith.constant 1 : i32
    %c8_i32_18 = arith.constant 8 : i32
    %45 = arith.muli %c1_i32, %c8_i32_18 : i32
    %46 = tpu.assume_multiple %45, 8 : i32
    %47 = arith.index_cast %46 : i32 to index
    %c0_19 = arith.constant 0 : index
    %48 = vector.load %arg9[%47, %c0_19] : memref<64x384xf32, #tpu.memory_space<vmem>>, vector<8x384xf32>
    %c0_20 = arith.constant 0 : index
    %c0_21 = arith.constant 0 : index
    %49 = vector.load %arg3[%c0_20, %c0_21] : memref<128x384xf32, #tpu.memory_space<vmem>>, vector<128x384xf32>
    %cst_22 = arith.constant dense<0.000000e+00> : vector<8x384xf32>
    %50 = tpu.matmul %42, %49, %cst_22 {dimension_numbers = #tpu.dot_dimension_numbers<[1], [0], [0], [1], [0, 0, 1, 1], [], []>} : vector<8x128xf32>, vector<128x384xf32>, vector<8x384xf32> -> vector<8x384xf32>
    %c0_23 = arith.constant 0 : index
    %c0_24 = arith.constant 0 : index
    %51 = vector.load %arg5[%c0_23, %c0_24] : memref<1x384xf32, #tpu.memory_space<vmem>>, vector<1x384xf32>
    %52 = vector.broadcast %51 : vector<1x384xf32> to vector<8x384xf32>
    %53 = arith.addf %50, %52 : vector<8x384xf32>
    %54 = vector.extract_strided_slice %48 {offsets = [0, 0], sizes = [8, 128], strides = [1, 1]} : vector<8x384xf32> to vector<8x128xf32>
    %55 = vector.extract_strided_slice %53 {offsets = [0, 0], sizes = [8, 128], strides = [1, 1]} : vector<8x384xf32> to vector<8x128xf32>
    %56 = arith.addf %54, %55 : vector<8x128xf32>
    %57 = arith.negf %56 : vector<8x128xf32>
    %58 = math.exp %57 : vector<8x128xf32>
    %cst_25 = arith.constant 1.000000e+00 : f32
    %59 = vector.broadcast %cst_25 : f32 to vector<8x128xf32>
    %60 = arith.addf %59, %58 : vector<8x128xf32>
    %61 = arith.divf %59, %60 : vector<8x128xf32>
    %62 = vector.extract_strided_slice %48 {offsets = [0, 128], sizes = [8, 128], strides = [1, 1]} : vector<8x384xf32> to vector<8x128xf32>
    %63 = vector.extract_strided_slice %53 {offsets = [0, 128], sizes = [8, 128], strides = [1, 1]} : vector<8x384xf32> to vector<8x128xf32>
    %64 = arith.addf %62, %63 : vector<8x128xf32>
    %65 = arith.negf %64 : vector<8x128xf32>
    %66 = math.exp %65 : vector<8x128xf32>
    %cst_26 = arith.constant 1.000000e+00 : f32
    %67 = vector.broadcast %cst_26 : f32 to vector<8x128xf32>
    %68 = arith.addf %67, %66 : vector<8x128xf32>
    %69 = arith.divf %67, %68 : vector<8x128xf32>
    %70 = vector.extract_strided_slice %48 {offsets = [0, 256], sizes = [8, 128], strides = [1, 1]} : vector<8x384xf32> to vector<8x128xf32>
    %71 = vector.extract_strided_slice %53 {offsets = [0, 256], sizes = [8, 128], strides = [1, 1]} : vector<8x384xf32> to vector<8x128xf32>
    %72 = arith.mulf %61, %71 : vector<8x128xf32>
    %73 = arith.addf %70, %72 : vector<8x128xf32>
    %74 = math.tanh %73 : vector<8x128xf32>
    %cst_27 = arith.constant 1.000000e+00 : f32
    %75 = vector.broadcast %cst_27 : f32 to vector<8x128xf32>
    %76 = arith.subf %75, %69 : vector<8x128xf32>
    %77 = arith.mulf %76, %74 : vector<8x128xf32>
    %78 = arith.mulf %69, %42 : vector<8x128xf32>
    %79 = arith.addf %77, %78 : vector<8x128xf32>
    %80 = arith.index_cast %46 : i32 to index
    %c0_28 = arith.constant 0 : index
    %81 = vector.load %arg10[%80, %c0_28] : memref<64x128xf32, #tpu.memory_space<vmem>>, vector<8x128xf32>
    tpu.vector_store %arg10[%80, %c0_28], %79 {strides = array<i32>} : memref<64x128xf32, #tpu.memory_space<vmem>>, vector<8x128xf32>,
    %c2_i32 = arith.constant 2 : i32
    %c8_i32_29 = arith.constant 8 : i32
    %82 = arith.muli %c2_i32, %c8_i32_29 : i32
    %83 = tpu.assume_multiple %82, 8 : i32
    %84 = arith.index_cast %83 : i32 to index
    %c0_30 = arith.constant 0 : index
    %85 = vector.load %arg9[%84, %c0_30] : memref<64x384xf32, #tpu.memory_space<vmem>>, vector<8x384xf32>
    %c0_31 = arith.constant 0 : index
    %c0_32 = arith.constant 0 : index
    %86 = vector.load %arg3[%c0_31, %c0_32] : memref<128x384xf32, #tpu.memory_space<vmem>>, vector<128x384xf32>
    %cst_33 = arith.constant dense<0.000000e+00> : vector<8x384xf32>
    %87 = tpu.matmul %79, %86, %cst_33 {dimension_numbers = #tpu.dot_dimension_numbers<[1], [0], [0], [1], [0, 0, 1, 1], [], []>} : vector<8x128xf32>, vector<128x384xf32>, vector<8x384xf32> -> vector<8x384xf32>
    %c0_34 = arith.constant 0 : index
    %c0_35 = arith.constant 0 : index
    %88 = vector.load %arg5[%c0_34, %c0_35] : memref<1x384xf32, #tpu.memory_space<vmem>>, vector<1x384xf32>
    %89 = vector.broadcast %88 : vector<1x384xf32> to vector<8x384xf32>
    %90 = arith.addf %87, %89 : vector<8x384xf32>
    %91 = vector.extract_strided_slice %85 {offsets = [0, 0], sizes = [8, 128], strides = [1, 1]} : vector<8x384xf32> to vector<8x128xf32>
    %92 = vector.extract_strided_slice %90 {offsets = [0, 0], sizes = [8, 128], strides = [1, 1]} : vector<8x384xf32> to vector<8x128xf32>
    %93 = arith.addf %91, %92 : vector<8x128xf32>
    %94 = arith.negf %93 : vector<8x128xf32>
    %95 = math.exp %94 : vector<8x128xf32>
    %cst_36 = arith.constant 1.000000e+00 : f32
    %96 = vector.broadcast %cst_36 : f32 to vector<8x128xf32>
    %97 = arith.addf %96, %95 : vector<8x128xf32>
    %98 = arith.divf %96, %97 : vector<8x128xf32>
    %99 = vector.extract_strided_slice %85 {offsets = [0, 128], sizes = [8, 128], strides = [1, 1]} : vector<8x384xf32> to vector<8x128xf32>
    %100 = vector.extract_strided_slice %90 {offsets = [0, 128], sizes = [8, 128], strides = [1, 1]} : vector<8x384xf32> to vector<8x128xf32>
    %101 = arith.addf %99, %100 : vector<8x128xf32>
    %102 = arith.negf %101 : vector<8x128xf32>
    %103 = math.exp %102 : vector<8x128xf32>
    %cst_37 = arith.constant 1.000000e+00 : f32
    %104 = vector.broadcast %cst_37 : f32 to vector<8x128xf32>
    %105 = arith.addf %104, %103 : vector<8x128xf32>
    %106 = arith.divf %104, %105 : vector<8x128xf32>
    %107 = vector.extract_strided_slice %85 {offsets = [0, 256], sizes = [8, 128], strides = [1, 1]} : vector<8x384xf32> to vector<8x128xf32>
    %108 = vector.extract_strided_slice %90 {offsets = [0, 256], sizes = [8, 128], strides = [1, 1]} : vector<8x384xf32> to vector<8x128xf32>
    %109 = arith.mulf %98, %108 : vector<8x128xf32>
    %110 = arith.addf %107, %109 : vector<8x128xf32>
    %111 = math.tanh %110 : vector<8x128xf32>
    %cst_38 = arith.constant 1.000000e+00 : f32
    %112 = vector.broadcast %cst_38 : f32 to vector<8x128xf32>
    %113 = arith.subf %112, %106 : vector<8x128xf32>
    %114 = arith.mulf %113, %111 : vector<8x128xf32>
    %115 = arith.mulf %106, %79 : vector<8x128xf32>
    %116 = arith.addf %114, %115 : vector<8x128xf32>
    %117 = arith.index_cast %83 : i32 to index
    %c0_39 = arith.constant 0 : index
    %118 = vector.load %arg10[%117, %c0_39] : memref<64x128xf32, #tpu.memory_space<vmem>>, vector<8x128xf32>
    tpu.vector_store %arg10[%117, %c0_39], %116 {strides = array<i32>} : memref<64x128xf32, #tpu.memory_space<vmem>>, vector<8x128xf32>,
    %c3_i32 = arith.constant 3 : i32
    %c8_i32_40 = arith.constant 8 : i32
    %119 = arith.muli %c3_i32, %c8_i32_40 : i32
    %120 = tpu.assume_multiple %119, 8 : i32
    %121 = arith.index_cast %120 : i32 to index
    %c0_41 = arith.constant 0 : index
    %122 = vector.load %arg9[%121, %c0_41] : memref<64x384xf32, #tpu.memory_space<vmem>>, vector<8x384xf32>
    %c0_42 = arith.constant 0 : index
    %c0_43 = arith.constant 0 : index
    %123 = vector.load %arg3[%c0_42, %c0_43] : memref<128x384xf32, #tpu.memory_space<vmem>>, vector<128x384xf32>
    %cst_44 = arith.constant dense<0.000000e+00> : vector<8x384xf32>
    %124 = tpu.matmul %116, %123, %cst_44 {dimension_numbers = #tpu.dot_dimension_numbers<[1], [0], [0], [1], [0, 0, 1, 1], [], []>} : vector<8x128xf32>, vector<128x384xf32>, vector<8x384xf32> -> vector<8x384xf32>
    %c0_45 = arith.constant 0 : index
    %c0_46 = arith.constant 0 : index
    %125 = vector.load %arg5[%c0_45, %c0_46] : memref<1x384xf32, #tpu.memory_space<vmem>>, vector<1x384xf32>
    %126 = vector.broadcast %125 : vector<1x384xf32> to vector<8x384xf32>
    %127 = arith.addf %124, %126 : vector<8x384xf32>
    %128 = vector.extract_strided_slice %122 {offsets = [0, 0], sizes = [8, 128], strides = [1, 1]} : vector<8x384xf32> to vector<8x128xf32>
    %129 = vector.extract_strided_slice %127 {offsets = [0, 0], sizes = [8, 128], strides = [1, 1]} : vector<8x384xf32> to vector<8x128xf32>
    %130 = arith.addf %128, %129 : vector<8x128xf32>
    %131 = arith.negf %130 : vector<8x128xf32>
    %132 = math.exp %131 : vector<8x128xf32>
    %cst_47 = arith.constant 1.000000e+00 : f32
    %133 = vector.broadcast %cst_47 : f32 to vector<8x128xf32>
    %134 = arith.addf %133, %132 : vector<8x128xf32>
    %135 = arith.divf %133, %134 : vector<8x128xf32>
    %136 = vector.extract_strided_slice %122 {offsets = [0, 128], sizes = [8, 128], strides = [1, 1]} : vector<8x384xf32> to vector<8x128xf32>
    %137 = vector.extract_strided_slice %127 {offsets = [0, 128], sizes = [8, 128], strides = [1, 1]} : vector<8x384xf32> to vector<8x128xf32>
    %138 = arith.addf %136, %137 : vector<8x128xf32>
    %139 = arith.negf %138 : vector<8x128xf32>
    %140 = math.exp %139 : vector<8x128xf32>
    %cst_48 = arith.constant 1.000000e+00 : f32
    %141 = vector.broadcast %cst_48 : f32 to vector<8x128xf32>
    %142 = arith.addf %141, %140 : vector<8x128xf32>
    %143 = arith.divf %141, %142 : vector<8x128xf32>
    %144 = vector.extract_strided_slice %122 {offsets = [0, 256], sizes = [8, 128], strides = [1, 1]} : vector<8x384xf32> to vector<8x128xf32>
    %145 = vector.extract_strided_slice %127 {offsets = [0, 256], sizes = [8, 128], strides = [1, 1]} : vector<8x384xf32> to vector<8x128xf32>
    %146 = arith.mulf %135, %145 : vector<8x128xf32>
    %147 = arith.addf %144, %146 : vector<8x128xf32>
    %148 = math.tanh %147 : vector<8x128xf32>
    %cst_49 = arith.constant 1.000000e+00 : f32
    %149 = vector.broadcast %cst_49 : f32 to vector<8x128xf32>
    %150 = arith.subf %149, %143 : vector<8x128xf32>
    %151 = arith.mulf %150, %148 : vector<8x128xf32>
    %152 = arith.mulf %143, %116 : vector<8x128xf32>
    %153 = arith.addf %151, %152 : vector<8x128xf32>
    %154 = arith.index_cast %120 : i32 to index
    %c0_50 = arith.constant 0 : index
    %155 = vector.load %arg10[%154, %c0_50] : memref<64x128xf32, #tpu.memory_space<vmem>>, vector<8x128xf32>
    tpu.vector_store %arg10[%154, %c0_50], %153 {strides = array<i32>} : memref<64x128xf32, #tpu.memory_space<vmem>>, vector<8x128xf32>,
    %c4_i32 = arith.constant 4 : i32
    %c8_i32_51 = arith.constant 8 : i32
    %156 = arith.muli %c4_i32, %c8_i32_51 : i32
    %157 = tpu.assume_multiple %156, 8 : i32
    %158 = arith.index_cast %157 : i32 to index
    %c0_52 = arith.constant 0 : index
    %159 = vector.load %arg9[%158, %c0_52] : memref<64x384xf32, #tpu.memory_space<vmem>>, vector<8x384xf32>
    %c0_53 = arith.constant 0 : index
    %c0_54 = arith.constant 0 : index
    %160 = vector.load %arg3[%c0_53, %c0_54] : memref<128x384xf32, #tpu.memory_space<vmem>>, vector<128x384xf32>
    %cst_55 = arith.constant dense<0.000000e+00> : vector<8x384xf32>
    %161 = tpu.matmul %153, %160, %cst_55 {dimension_numbers = #tpu.dot_dimension_numbers<[1], [0], [0], [1], [0, 0, 1, 1], [], []>} : vector<8x128xf32>, vector<128x384xf32>, vector<8x384xf32> -> vector<8x384xf32>
    %c0_56 = arith.constant 0 : index
    %c0_57 = arith.constant 0 : index
    %162 = vector.load %arg5[%c0_56, %c0_57] : memref<1x384xf32, #tpu.memory_space<vmem>>, vector<1x384xf32>
    %163 = vector.broadcast %162 : vector<1x384xf32> to vector<8x384xf32>
    %164 = arith.addf %161, %163 : vector<8x384xf32>
    %165 = vector.extract_strided_slice %159 {offsets = [0, 0], sizes = [8, 128], strides = [1, 1]} : vector<8x384xf32> to vector<8x128xf32>
    %166 = vector.extract_strided_slice %164 {offsets = [0, 0], sizes = [8, 128], strides = [1, 1]} : vector<8x384xf32> to vector<8x128xf32>
    %167 = arith.addf %165, %166 : vector<8x128xf32>
    %168 = arith.negf %167 : vector<8x128xf32>
    %169 = math.exp %168 : vector<8x128xf32>
    %cst_58 = arith.constant 1.000000e+00 : f32
    %170 = vector.broadcast %cst_58 : f32 to vector<8x128xf32>
    %171 = arith.addf %170, %169 : vector<8x128xf32>
    %172 = arith.divf %170, %171 : vector<8x128xf32>
    %173 = vector.extract_strided_slice %159 {offsets = [0, 128], sizes = [8, 128], strides = [1, 1]} : vector<8x384xf32> to vector<8x128xf32>
    %174 = vector.extract_strided_slice %164 {offsets = [0, 128], sizes = [8, 128], strides = [1, 1]} : vector<8x384xf32> to vector<8x128xf32>
    %175 = arith.addf %173, %174 : vector<8x128xf32>
    %176 = arith.negf %175 : vector<8x128xf32>
    %177 = math.exp %176 : vector<8x128xf32>
    %cst_59 = arith.constant 1.000000e+00 : f32
    %178 = vector.broadcast %cst_59 : f32 to vector<8x128xf32>
    %179 = arith.addf %178, %177 : vector<8x128xf32>
    %180 = arith.divf %178, %179 : vector<8x128xf32>
    %181 = vector.extract_strided_slice %159 {offsets = [0, 256], sizes = [8, 128], strides = [1, 1]} : vector<8x384xf32> to vector<8x128xf32>
    %182 = vector.extract_strided_slice %164 {offsets = [0, 256], sizes = [8, 128], strides = [1, 1]} : vector<8x384xf32> to vector<8x128xf32>
    %183 = arith.mulf %172, %182 : vector<8x128xf32>
    %184 = arith.addf %181, %183 : vector<8x128xf32>
    %185 = math.tanh %184 : vector<8x128xf32>
    %cst_60 = arith.constant 1.000000e+00 : f32
    %186 = vector.broadcast %cst_60 : f32 to vector<8x128xf32>
    %187 = arith.subf %186, %180 : vector<8x128xf32>
    %188 = arith.mulf %187, %185 : vector<8x128xf32>
    %189 = arith.mulf %180, %153 : vector<8x128xf32>
    %190 = arith.addf %188, %189 : vector<8x128xf32>
    %191 = arith.index_cast %157 : i32 to index
    %c0_61 = arith.constant 0 : index
    %192 = vector.load %arg10[%191, %c0_61] : memref<64x128xf32, #tpu.memory_space<vmem>>, vector<8x128xf32>
    tpu.vector_store %arg10[%191, %c0_61], %190 {strides = array<i32>} : memref<64x128xf32, #tpu.memory_space<vmem>>, vector<8x128xf32>,
    %c5_i32 = arith.constant 5 : i32
    %c8_i32_62 = arith.constant 8 : i32
    %193 = arith.muli %c5_i32, %c8_i32_62 : i32
    %194 = tpu.assume_multiple %193, 8 : i32
    %195 = arith.index_cast %194 : i32 to index
    %c0_63 = arith.constant 0 : index
    %196 = vector.load %arg9[%195, %c0_63] : memref<64x384xf32, #tpu.memory_space<vmem>>, vector<8x384xf32>
    %c0_64 = arith.constant 0 : index
    %c0_65 = arith.constant 0 : index
    %197 = vector.load %arg3[%c0_64, %c0_65] : memref<128x384xf32, #tpu.memory_space<vmem>>, vector<128x384xf32>
    %cst_66 = arith.constant dense<0.000000e+00> : vector<8x384xf32>
    %198 = tpu.matmul %190, %197, %cst_66 {dimension_numbers = #tpu.dot_dimension_numbers<[1], [0], [0], [1], [0, 0, 1, 1], [], []>} : vector<8x128xf32>, vector<128x384xf32>, vector<8x384xf32> -> vector<8x384xf32>
    %c0_67 = arith.constant 0 : index
    %c0_68 = arith.constant 0 : index
    %199 = vector.load %arg5[%c0_67, %c0_68] : memref<1x384xf32, #tpu.memory_space<vmem>>, vector<1x384xf32>
    %200 = vector.broadcast %199 : vector<1x384xf32> to vector<8x384xf32>
    %201 = arith.addf %198, %200 : vector<8x384xf32>
    %202 = vector.extract_strided_slice %196 {offsets = [0, 0], sizes = [8, 128], strides = [1, 1]} : vector<8x384xf32> to vector<8x128xf32>
    %203 = vector.extract_strided_slice %201 {offsets = [0, 0], sizes = [8, 128], strides = [1, 1]} : vector<8x384xf32> to vector<8x128xf32>
    %204 = arith.addf %202, %203 : vector<8x128xf32>
    %205 = arith.negf %204 : vector<8x128xf32>
    %206 = math.exp %205 : vector<8x128xf32>
    %cst_69 = arith.constant 1.000000e+00 : f32
    %207 = vector.broadcast %cst_69 : f32 to vector<8x128xf32>
    %208 = arith.addf %207, %206 : vector<8x128xf32>
    %209 = arith.divf %207, %208 : vector<8x128xf32>
    %210 = vector.extract_strided_slice %196 {offsets = [0, 128], sizes = [8, 128], strides = [1, 1]} : vector<8x384xf32> to vector<8x128xf32>
    %211 = vector.extract_strided_slice %201 {offsets = [0, 128], sizes = [8, 128], strides = [1, 1]} : vector<8x384xf32> to vector<8x128xf32>
    %212 = arith.addf %210, %211 : vector<8x128xf32>
    %213 = arith.negf %212 : vector<8x128xf32>
    %214 = math.exp %213 : vector<8x128xf32>
    %cst_70 = arith.constant 1.000000e+00 : f32
    %215 = vector.broadcast %cst_70 : f32 to vector<8x128xf32>
    %216 = arith.addf %215, %214 : vector<8x128xf32>
    %217 = arith.divf %215, %216 : vector<8x128xf32>
    %218 = vector.extract_strided_slice %196 {offsets = [0, 256], sizes = [8, 128], strides = [1, 1]} : vector<8x384xf32> to vector<8x128xf32>
    %219 = vector.extract_strided_slice %201 {offsets = [0, 256], sizes = [8, 128], strides = [1, 1]} : vector<8x384xf32> to vector<8x128xf32>
    %220 = arith.mulf %209, %219 : vector<8x128xf32>
    %221 = arith.addf %218, %220 : vector<8x128xf32>
    %222 = math.tanh %221 : vector<8x128xf32>
    %cst_71 = arith.constant 1.000000e+00 : f32
    %223 = vector.broadcast %cst_71 : f32 to vector<8x128xf32>
    %224 = arith.subf %223, %217 : vector<8x128xf32>
    %225 = arith.mulf %224, %222 : vector<8x128xf32>
    %226 = arith.mulf %217, %190 : vector<8x128xf32>
    %227 = arith.addf %225, %226 : vector<8x128xf32>
    %228 = arith.index_cast %194 : i32 to index
    %c0_72 = arith.constant 0 : index
    %229 = vector.load %arg10[%228, %c0_72] : memref<64x128xf32, #tpu.memory_space<vmem>>, vector<8x128xf32>
    tpu.vector_store %arg10[%228, %c0_72], %227 {strides = array<i32>} : memref<64x128xf32, #tpu.memory_space<vmem>>, vector<8x128xf32>,
    %c6_i32 = arith.constant 6 : i32
    %c8_i32_73 = arith.constant 8 : i32
    %230 = arith.muli %c6_i32, %c8_i32_73 : i32
    %231 = tpu.assume_multiple %230, 8 : i32
    %232 = arith.index_cast %231 : i32 to index
    %c0_74 = arith.constant 0 : index
    %233 = vector.load %arg9[%232, %c0_74] : memref<64x384xf32, #tpu.memory_space<vmem>>, vector<8x384xf32>
    %c0_75 = arith.constant 0 : index
    %c0_76 = arith.constant 0 : index
    %234 = vector.load %arg3[%c0_75, %c0_76] : memref<128x384xf32, #tpu.memory_space<vmem>>, vector<128x384xf32>
    %cst_77 = arith.constant dense<0.000000e+00> : vector<8x384xf32>
    %235 = tpu.matmul %227, %234, %cst_77 {dimension_numbers = #tpu.dot_dimension_numbers<[1], [0], [0], [1], [0, 0, 1, 1], [], []>} : vector<8x128xf32>, vector<128x384xf32>, vector<8x384xf32> -> vector<8x384xf32>
    %c0_78 = arith.constant 0 : index
    %c0_79 = arith.constant 0 : index
    %236 = vector.load %arg5[%c0_78, %c0_79] : memref<1x384xf32, #tpu.memory_space<vmem>>, vector<1x384xf32>
    %237 = vector.broadcast %236 : vector<1x384xf32> to vector<8x384xf32>
    %238 = arith.addf %235, %237 : vector<8x384xf32>
    %239 = vector.extract_strided_slice %233 {offsets = [0, 0], sizes = [8, 128], strides = [1, 1]} : vector<8x384xf32> to vector<8x128xf32>
    %240 = vector.extract_strided_slice %238 {offsets = [0, 0], sizes = [8, 128], strides = [1, 1]} : vector<8x384xf32> to vector<8x128xf32>
    %241 = arith.addf %239, %240 : vector<8x128xf32>
    %242 = arith.negf %241 : vector<8x128xf32>
    %243 = math.exp %242 : vector<8x128xf32>
    %cst_80 = arith.constant 1.000000e+00 : f32
    %244 = vector.broadcast %cst_80 : f32 to vector<8x128xf32>
    %245 = arith.addf %244, %243 : vector<8x128xf32>
    %246 = arith.divf %244, %245 : vector<8x128xf32>
    %247 = vector.extract_strided_slice %233 {offsets = [0, 128], sizes = [8, 128], strides = [1, 1]} : vector<8x384xf32> to vector<8x128xf32>
    %248 = vector.extract_strided_slice %238 {offsets = [0, 128], sizes = [8, 128], strides = [1, 1]} : vector<8x384xf32> to vector<8x128xf32>
    %249 = arith.addf %247, %248 : vector<8x128xf32>
    %250 = arith.negf %249 : vector<8x128xf32>
    %251 = math.exp %250 : vector<8x128xf32>
    %cst_81 = arith.constant 1.000000e+00 : f32
    %252 = vector.broadcast %cst_81 : f32 to vector<8x128xf32>
    %253 = arith.addf %252, %251 : vector<8x128xf32>
    %254 = arith.divf %252, %253 : vector<8x128xf32>
    %255 = vector.extract_strided_slice %233 {offsets = [0, 256], sizes = [8, 128], strides = [1, 1]} : vector<8x384xf32> to vector<8x128xf32>
    %256 = vector.extract_strided_slice %238 {offsets = [0, 256], sizes = [8, 128], strides = [1, 1]} : vector<8x384xf32> to vector<8x128xf32>
    %257 = arith.mulf %246, %256 : vector<8x128xf32>
    %258 = arith.addf %255, %257 : vector<8x128xf32>
    %259 = math.tanh %258 : vector<8x128xf32>
    %cst_82 = arith.constant 1.000000e+00 : f32
    %260 = vector.broadcast %cst_82 : f32 to vector<8x128xf32>
    %261 = arith.subf %260, %254 : vector<8x128xf32>
    %262 = arith.mulf %261, %259 : vector<8x128xf32>
    %263 = arith.mulf %254, %227 : vector<8x128xf32>
    %264 = arith.addf %262, %263 : vector<8x128xf32>
    %265 = arith.index_cast %231 : i32 to index
    %c0_83 = arith.constant 0 : index
    %266 = vector.load %arg10[%265, %c0_83] : memref<64x128xf32, #tpu.memory_space<vmem>>, vector<8x128xf32>
    tpu.vector_store %arg10[%265, %c0_83], %264 {strides = array<i32>} : memref<64x128xf32, #tpu.memory_space<vmem>>, vector<8x128xf32>,
    %c7_i32 = arith.constant 7 : i32
    %c8_i32_84 = arith.constant 8 : i32
    %267 = arith.muli %c7_i32, %c8_i32_84 : i32
    %268 = tpu.assume_multiple %267, 8 : i32
    %269 = arith.index_cast %268 : i32 to index
    %c0_85 = arith.constant 0 : index
    %270 = vector.load %arg9[%269, %c0_85] : memref<64x384xf32, #tpu.memory_space<vmem>>, vector<8x384xf32>
    %c0_86 = arith.constant 0 : index
    %c0_87 = arith.constant 0 : index
    %271 = vector.load %arg3[%c0_86, %c0_87] : memref<128x384xf32, #tpu.memory_space<vmem>>, vector<128x384xf32>
    %cst_88 = arith.constant dense<0.000000e+00> : vector<8x384xf32>
    %272 = tpu.matmul %264, %271, %cst_88 {dimension_numbers = #tpu.dot_dimension_numbers<[1], [0], [0], [1], [0, 0, 1, 1], [], []>} : vector<8x128xf32>, vector<128x384xf32>, vector<8x384xf32> -> vector<8x384xf32>
    %c0_89 = arith.constant 0 : index
    %c0_90 = arith.constant 0 : index
    %273 = vector.load %arg5[%c0_89, %c0_90] : memref<1x384xf32, #tpu.memory_space<vmem>>, vector<1x384xf32>
    %274 = vector.broadcast %273 : vector<1x384xf32> to vector<8x384xf32>
    %275 = arith.addf %272, %274 : vector<8x384xf32>
    %276 = vector.extract_strided_slice %270 {offsets = [0, 0], sizes = [8, 128], strides = [1, 1]} : vector<8x384xf32> to vector<8x128xf32>
    %277 = vector.extract_strided_slice %275 {offsets = [0, 0], sizes = [8, 128], strides = [1, 1]} : vector<8x384xf32> to vector<8x128xf32>
    %278 = arith.addf %276, %277 : vector<8x128xf32>
    %279 = arith.negf %278 : vector<8x128xf32>
    %280 = math.exp %279 : vector<8x128xf32>
    %cst_91 = arith.constant 1.000000e+00 : f32
    %281 = vector.broadcast %cst_91 : f32 to vector<8x128xf32>
    %282 = arith.addf %281, %280 : vector<8x128xf32>
    %283 = arith.divf %281, %282 : vector<8x128xf32>
    %284 = vector.extract_strided_slice %270 {offsets = [0, 128], sizes = [8, 128], strides = [1, 1]} : vector<8x384xf32> to vector<8x128xf32>
    %285 = vector.extract_strided_slice %275 {offsets = [0, 128], sizes = [8, 128], strides = [1, 1]} : vector<8x384xf32> to vector<8x128xf32>
    %286 = arith.addf %284, %285 : vector<8x128xf32>
    %287 = arith.negf %286 : vector<8x128xf32>
    %288 = math.exp %287 : vector<8x128xf32>
    %cst_92 = arith.constant 1.000000e+00 : f32
    %289 = vector.broadcast %cst_92 : f32 to vector<8x128xf32>
    %290 = arith.addf %289, %288 : vector<8x128xf32>
    %291 = arith.divf %289, %290 : vector<8x128xf32>
    %292 = vector.extract_strided_slice %270 {offsets = [0, 256], sizes = [8, 128], strides = [1, 1]} : vector<8x384xf32> to vector<8x128xf32>
    %293 = vector.extract_strided_slice %275 {offsets = [0, 256], sizes = [8, 128], strides = [1, 1]} : vector<8x384xf32> to vector<8x128xf32>
    %294 = arith.mulf %283, %293 : vector<8x128xf32>
    %295 = arith.addf %292, %294 : vector<8x128xf32>
    %296 = math.tanh %295 : vector<8x128xf32>
    %cst_93 = arith.constant 1.000000e+00 : f32
    %297 = vector.broadcast %cst_93 : f32 to vector<8x128xf32>
    %298 = arith.subf %297, %291 : vector<8x128xf32>
    %299 = arith.mulf %298, %296 : vector<8x128xf32>
    %300 = arith.mulf %291, %264 : vector<8x128xf32>
    %301 = arith.addf %299, %300 : vector<8x128xf32>
    %302 = arith.index_cast %268 : i32 to index
    %c0_94 = arith.constant 0 : index
    %303 = vector.load %arg10[%302, %c0_94] : memref<64x128xf32, #tpu.memory_space<vmem>>, vector<8x128xf32>
    tpu.vector_store %arg10[%302, %c0_94], %301 {strides = array<i32>} : memref<64x128xf32, #tpu.memory_space<vmem>>, vector<8x128xf32>,
    %c8_i32_95 = arith.constant 8 : i32
    %c0_96 = arith.constant 0 : index
    %c0_97 = arith.constant 0 : index
    %304 = vector.load %arg10[%c0_96, %c0_97] : memref<64x128xf32, #tpu.memory_space<vmem>>, vector<64x128xf32>
    %c0_98 = arith.constant 0 : index
    %c0_99 = arith.constant 0 : index
    %305 = vector.load %arg6[%c0_98, %c0_99] : memref<128x128xf32, #tpu.memory_space<vmem>>, vector<128x128xf32>
    %cst_100 = arith.constant dense<0.000000e+00> : vector<64x128xf32>
    %306 = tpu.matmul %304, %305, %cst_100 {dimension_numbers = #tpu.dot_dimension_numbers<[1], [0], [0], [1], [0, 0, 1, 1], [], []>} : vector<64x128xf32>, vector<128x128xf32>, vector<64x128xf32> -> vector<64x128xf32>
    %c0_101 = arith.constant 0 : index
    %c0_102 = arith.constant 0 : index
    %307 = vector.load %arg7[%c0_101, %c0_102] : memref<1x128xf32, #tpu.memory_space<vmem>>, vector<1x128xf32>
    %308 = vector.broadcast %307 : vector<1x128xf32> to vector<64x128xf32>
    %309 = arith.addf %306, %308 : vector<64x128xf32>
    %cst_103 = arith.constant dense<0xFF800000> : vector<64xf32>
    %310 = vector.multi_reduction <maximumf>, %309, %cst_103 [1] : vector<64x128xf32> to vector<64xf32>
    %311 = vector.shape_cast %310 : vector<64xf32> to vector<64x1xf32>
    %312 = vector.broadcast %311 : vector<64x1xf32> to vector<64x128xf32>
    %313 = arith.subf %309, %312 : vector<64x128xf32>
    %314 = math.exp %313 : vector<64x128xf32>
    %cst_104 = arith.constant dense<0.000000e+00> : vector<64xf32>
    %315 = vector.multi_reduction <add>, %314, %cst_104 [1] : vector<64x128xf32> to vector<64xf32>
    %316 = vector.shape_cast %315 : vector<64xf32> to vector<64x1xf32>
    %317 = tpu.reciprocal %316 : vector<64x1xf32> -> vector<64x1xf32>
    %318 = vector.broadcast %317 : vector<64x1xf32> to vector<64x128xf32>
    %319 = arith.mulf %314, %318 : vector<64x128xf32>
    %c0_105 = arith.constant 0 : index
    %c0_106 = arith.constant 0 : index
    %320 = vector.load %arg8[%c0_105, %c0_106] : memref<64x128xf32, #tpu.memory_space<vmem>>, vector<64x128xf32>
    tpu.vector_store %arg8[%c0_105, %c0_106], %319 {strides = array<i32>} : memref<64x128xf32, #tpu.memory_space<vmem>>, vector<64x128xf32>,
    return
  }
  func.func @transform_0(%arg0: i32) -> (i32, i32) {
    %c0_i32 = arith.constant 0 : i32
    %c0_i32_0 = arith.constant 0 : i32
    %c0_i32_1 = arith.constant 0 : i32
    return %c0_i32, %c0_i32_0 : i32, i32
  }
  func.func @transform_1(%arg0: i32) -> (i32, i32) {
    %c0_i32 = arith.constant 0 : i32
    %c0_i32_0 = arith.constant 0 : i32
    %c0_i32_1 = arith.constant 0 : i32
    return %c0_i32, %c0_i32_0 : i32, i32
  }
  func.func @transform_2(%arg0: i32) -> (i32, i32) {
    %c0_i32 = arith.constant 0 : i32
    %c0_i32_0 = arith.constant 0 : i32
    %c0_i32_1 = arith.constant 0 : i32
    return %c0_i32, %c0_i32_0 : i32, i32
  }
  func.func @transform_3(%arg0: i32) -> (i32, i32) {
    %c0_i32 = arith.constant 0 : i32
    %c0_i32_0 = arith.constant 0 : i32
    %c0_i32_1 = arith.constant 0 : i32
    return %c0_i32, %c0_i32_0 : i32, i32
  }
  func.func @transform_4(%arg0: i32) -> (i32, i32) {
    %c0_i32 = arith.constant 0 : i32
    %c0_i32_0 = arith.constant 0 : i32
    %c0_i32_1 = arith.constant 0 : i32
    return %c0_i32, %c0_i32_0 : i32, i32
  }
  func.func @transform_5(%arg0: i32) -> (i32, i32) {
    %c0_i32 = arith.constant 0 : i32
    %c0_i32_0 = arith.constant 0 : i32
    %c0_i32_1 = arith.constant 0 : i32
    return %c0_i32, %c0_i32_0 : i32, i32
  }
  func.func @transform_6(%arg0: i32) -> (i32, i32) {
    %c0_i32 = arith.constant 0 : i32
    %c0_i32_0 = arith.constant 0 : i32
    %c0_i32_1 = arith.constant 0 : i32
    return %c0_i32, %c0_i32_0 : i32, i32
  }
  func.func @transform_7(%arg0: i32) -> (i32, i32) {
    %c0_i32 = arith.constant 0 : i32
    %c0_i32_0 = arith.constant 0 : i32
    %c0_i32_1 = arith.constant 0 : i32
    return %c0_i32, %c0_i32_0 : i32, i32
  }
}

</mosaic_0001>

<bundles_post_ra>
// kernel: vad_forward.2
= control target key start
LH: loop header
LB: loop body
LE: loop exit
PB: predicated region body
PF: predicated region fallthrough
CT: control target
= control target key end

     0   :  { %v284_v3 = vmov 0.0   ;;  %vm23_vm0 = vcmask 130048   ;;  %s368_s1 = inlined_call_operand.vmem [shape: f32[16,256], index: 1, kind: input, shape index: {}]   ;;  %s369_s0 = inlined_call_operand.vmem [shape: f32[64,16], index: 0, kind: input, shape index: {}]   ;;  %s370_s2 = inlined_call_operand.vmem [shape: f32[64,128], index: 2, kind: output, shape index: {}]  }
   0x1   :  { %v20_v0 = vld [vmem:[%s368_s1 + $0x8] sm:$0xff]  ;;  %v22_v1 = vld [vmem:[%s368_s1 + $0x18] sm:$0xff]  ;;  %v19_v2 = vld [vmem:[%s368_s1] sm:$0xff]  ;;  %112 = vmatprep.mubr.f32.mxu0 %v284_v3  ;;  %136 = vmatprep.mubr.f32.mxu1 %v284_v3 }
   0x2   :  { %v261_v4 = vpack.c.bf16 %v22_v1, %v20_v0  ;;  %v21_v5 = vld [vmem:[%s368_s1 + $0x10] sm:$0xff]  ;;  %v11_v7 = vld [vmem:[%s369_s0] sm:$0xff]  ;;  %v12_v9 = vld [vmem:[%s369_s0 + $0x8] sm:$0xff] }
   0x3   :  { %v263_v6 = vpack.c.bf16 %v21_v5, %v19_v2  ;;  %v15_v8 = vld [vmem:[%s369_s0 + $0x20] sm:$0xff]  ;;  %v16_v10 = vld [vmem:[%s369_s0 + $0x28] sm:$0xff]  ;;  %v13_v11 = vld [vmem:[%s369_s0 + $0x10] sm:$0xff] }
   0x4   :  { %262 = vmatprep.subr.bf16.mxu0 %v261_v4  ;;  %265 = vmatprep.subr.bf16.mxu1 %v261_v4  ;;  %v17_v12 = vld [vmem:[%s369_s0 + $0x30] sm:$0xff]  ;;  %v14_v13 = vld [vmem:[%s369_s0 + $0x18] sm:$0xff] }
   0x5   :  { %264 = vmatpush1.bf16.msra.mxu0 %v263_v6  ;;  %266 = vmatpush1.bf16.msra.mxu1 %v263_v6  ;;  %v18_v14 = vld [vmem:[%s369_s0 + $0x38] sm:$0xff] }
   0x8   :  { %253 = vmatmul.mubr.msk.f32.vlgmr.msra.gmra.mrb[0].mxu0 %vm23_vm0, %v11_v7  ;;  %257 = vmatmul.mubr.msk.f32.vlgmr.msra.gmra.mrb[0].mxu1 %vm23_vm0, %v15_v8 }
   0x9   :  { %118 = vmatprep.mubr.f32.mxu0 %v284_v3  ;;  %142 = vmatprep.mubr.f32.mxu1 %v284_v3 }
   0xc   :  { %254 = vmatmul.mubr.msk.f32.gmra.mrb[2].mxu0 %vm23_vm0, %v12_v9  ;;  %258 = vmatmul.mubr.msk.f32.gmra.mrb[2].mxu1 %vm23_vm0, %v16_v10 }
   0xd   :  { %124 = vmatprep.mubr.f32.mxu0 %v284_v3  ;;  %148 = vmatprep.mubr.f32.mxu1 %v284_v3 }
  0x10   :  { %255 = vmatmul.mubr.msk.f32.gmra.mrb[4].mxu0 %vm23_vm0, %v13_v11  ;;  %259 = vmatmul.mubr.msk.f32.gmra.mrb[4].mxu1 %vm23_vm0, %v17_v12 }
  0x11   :  { %130 = vmatprep.mubr.f32.mxu0 %v284_v3  ;;  %154 = vmatprep.mubr.f32.mxu1 %v284_v3 }
  0x14   :  { %256 = vmatmul.mubr.msk.f32.gmra.mrb[6].mxu0 %vm23_vm0, %v14_v13  ;;  %260 = vmatmul.mubr.msk.f32.gmra.mrb[6].mxu1 %vm23_vm0, %v18_v14 }
  0xdb   :  { %v114_v15 = vpop.f32.mrb[0].mxu0  ;;  %v138_v16 = vpop.f32.mrb[0].mxu1 }
  0xdc   :  { %v161_v17 = vmul.f32 %v114_v15, %v114_v15  ;;  %v165_v18 = vmul.f32 %v138_v16, %v138_v16  ;;  %v116_v19 = vpop.f32.mrb[1].mxu0  ;;  %v140_v20 = vpop.f32.mrb[1].mxu1 }
  0xdd   :  { %v169_v21 = vmul.f32 %v116_v19, %v116_v19  ;;  %v173_v22 = vmul.f32 %v140_v20, %v140_v20 }
  0xdf   :  { %v177_v23 = vadd.f32 %v169_v21, %v161_v17  ;;  %v181_v24 = vadd.f32 %v173_v22, %v165_v18  ;;  %v120_v25 = vpop.f32.mrb[2].mxu0  ;;  %v144_v26 = vpop.f32.mrb[2].mxu1 }
  0xe0   :  { %v122_v27 = vpop.f32.mrb[3].mxu0  ;;  %v146_v28 = vpop.f32.mrb[3].mxu1  ;;  %v162_v29 = vmul.f32 %v120_v25, %v120_v25  ;;  %v166_v30 = vmul.f32 %v144_v26, %v144_v26 }
  0xe1   :  { %268 = vrsqrt.f32 %v177_v23  ;;  %v170_v31 = vmul.f32 %v122_v27, %v122_v27  ;;  %v174_v32 = vmul.f32 %v146_v28, %v146_v28  ;;  %vm187_vm1 = vcmp.eq.f32.partialorder %v177_v23, inf }
  0xe2   :  { %270 = vrsqrt.f32 %v181_v24  ;;  %v190_v56 = vand.u32 2147483648, %v177_v23  ;;  %vm189_vm2 = vcmp.eq.f32.partialorder %v177_v23, 0.0  ;;  %vm215_vm3 = vcmp.eq.f32.partialorder %v181_v24, inf }
  0xe3   :  { %v126_v33 = vpop.f32.mrb[4].mxu0  ;;  %v150_v34 = vpop.f32.mrb[4].mxu1  ;;  %v178_v39 = vadd.f32 %v170_v31, %v162_v29  ;;  %v182_v40 = vadd.f32 %v174_v32, %v166_v30  ;;  %v218_v61 = vand.u32 2147483648, %v181_v24  ;;  %vm217_vm4 = vcmp.eq.f32.partialorder %v181_v24, 0.0 }
  0xe4   :  { %v163_v35 = vmul.f32 %v126_v33, %v126_v33  ;;  %v167_v36 = vmul.f32 %v150_v34, %v150_v34  ;;  %v128_v37 = vpop.f32.mrb[5].mxu0  ;;  %v152_v38 = vpop.f32.mrb[5].mxu1 }
  0xe5   :  { %v171_v41 = vmul.f32 %v128_v37, %v128_v37  ;;  %v175_v42 = vmul.f32 %v152_v38, %v152_v38  ;;  %272 = vrsqrt.f32 %v178_v39  ;;  %vm194_vm5 = vcmp.eq.f32.partialorder %v178_v39, inf }
  0xe6   :  { %274 = vrsqrt.f32 %v182_v40  ;;  %v197_v4 = vand.u32 2147483648, %v178_v39  ;;  %vm196_vm6 = vcmp.eq.f32.partialorder %v178_v39, 0.0  ;;  %vm222_vm7 = vcmp.eq.f32.partialorder %v182_v40, inf }
  0xe7   :  { %v132_v43 = vpop.f32.mrb[6].mxu0  ;;  %v156_v44 = vpop.f32.mrb[6].mxu1  ;;  %v179_v47 = vadd.f32 %v171_v41, %v163_v35  ;;  %v183_v48 = vadd.f32 %v175_v42, %v167_v36  ;;  %v225_v7 = vand.u32 2147483648, %v182_v40  ;;  %vm224_vm8 = vcmp.eq.f32.partialorder %v182_v40, 0.0 }
  0xe8   :  { %v134_v45 = vpop.f32.mrb[7].mxu0  ;;  %v158_v46 = vpop.f32.mrb[7].mxu1  ;;  %v164_v49 = vmul.f32 %v132_v43, %v132_v43  ;;  %v168_v50 = vmul.f32 %v156_v44, %v156_v44 }
  0xe9   :  { %v172_v51 = vmul.f32 %v134_v45, %v134_v45  ;;  %v176_v52 = vmul.f32 %v158_v46, %v158_v46  ;;  %276 = vrsqrt.f32 %v179_v47  ;;  %vm201_vm9 = vcmp.eq.f32.partialorder %v179_v47, inf }
  0xea   :  { %278 = vrsqrt.f32 %v183_v48  ;;  %v204_v14 = vand.u32 2147483648, %v179_v47  ;;  %vm203_vm10 = vcmp.eq.f32.partialorder %v179_v47, 0.0  ;;  %vm229_vm11 = vcmp.eq.f32.partialorder %v183_v48, inf }
  0xeb   :  { %v269_v53 = vpop.eup %268  ;;  %v180_v58 = vadd.f32 %v172_v51, %v164_v49  ;;  %v184_v59 = vadd.f32 %v176_v52, %v168_v50  ;;  %v232_v17 = vand.u32 2147483648, %v183_v48  ;;  %vm231_vm12 = vcmp.eq.f32.partialorder %v183_v48, 0.0 }
  0xec   :  { %v271_v54 = vpop.eup %270  ;;  %v186_v55 = vmul.f32 %v269_v53, %v177_v23 }
  0xed   :  { %v214_v57 = vmul.f32 %v271_v54, %v181_v24  ;;  %280 = vrsqrt.f32 %v180_v58  ;;  %vm208_vm13 = vcmp.eq.f32.partialorder %v180_v58, inf  ;;  %vm210_vm14 = vcmp.eq.f32.partialorder %v180_v58, 0.0 }
  0xee   :  { %v188_v60 = vsel %vm187_vm1, %v177_v23, %v186_v55  ;;  %282 = vrsqrt.f32 %v184_v59  ;;  %vm236_vm15 = vcmp.eq.f32.partialorder %v184_v59, inf  ;;  %v239_v27 = vand.u32 2147483648, %v184_v59 }
  0xef   :  { %v191_v62 = vsel %vm189_vm2, %v190_v56, %v188_v60  ;;  %v216_v63 = vsel %vm215_vm3, %v181_v24, %v214_v57  ;;  %v273_v1 = vpop.eup %272  ;;  %v211_v24 = vand.u32 2147483648, %v180_v58  ;;  %vm238_vm0 = vcmp.eq.f32.partialorder %v184_v59, 0.0 }
  0xf0   :  { %241 = vst [vmem:[%s370_s2] sm:$0xff] %v191_v62  ;;  %v219_v0 = vsel %vm217_vm4, %v218_v61, %v216_v63  ;;  %v275_v2 = vpop.eup %274  ;;  %v193_v3 = vmul.f32 %v273_v1, %v178_v39 }
  0xf1   :  { %245 = vst [vmem:[%s370_s2 + $0x20] sm:$0xff] %v219_v0  ;;  %v221_v5 = vmul.f32 %v275_v2, %v182_v40 }
  0xf2   :  { %v195_v6 = vsel %vm194_vm5, %v178_v39, %v193_v3 }
  0xf3   :  { %v277_v8 = vpop.eup %276  ;;  %v198_v9 = vsel %vm196_vm6, %v197_v4, %v195_v6  ;;  %v223_v10 = vsel %vm222_vm7, %v182_v40, %v221_v5 }
  0xf4   :  { %v279_v11 = vpop.eup %278  ;;  %242 = vst [vmem:[%s370_s2 + $0x8] sm:$0xff] %v198_v9  ;;  %v226_v12 = vsel %vm224_vm8, %v225_v7, %v223_v10  ;;  %v200_v13 = vmul.f32 %v277_v8, %v179_v47 }
  0xf5   :  { %246 = vst [vmem:[%s370_s2 + $0x28] sm:$0xff] %v226_v12  ;;  %v228_v15 = vmul.f32 %v279_v11, %v183_v48 }
  0xf6   :  { %v202_v16 = vsel %vm201_vm9, %v179_v47, %v200_v13 }
  0xf7   :  { %v281_v18 = vpop.eup %280  ;;  %v205_v19 = vsel %vm203_vm10, %v204_v14, %v202_v16  ;;  %v230_v20 = vsel %vm229_vm11, %v183_v48, %v228_v15 }
  0xf8   :  { %v283_v21 = vpop.eup %282  ;;  %243 = vst [vmem:[%s370_s2 + $0x10] sm:$0xff] %v205_v19  ;;  %v233_v22 = vsel %vm231_vm12, %v232_v17, %v230_v20  ;;  %v207_v23 = vmul.f32 %v281_v18, %v180_v58 }
  0xf9   :  { %247 = vst [vmem:[%s370_s2 + $0x30] sm:$0xff] %v233_v22  ;;  %v235_v25 = vmul.f32 %v283_v21, %v184_v59 }
  0xfa   :  { %v209_v26 = vsel %vm208_vm13, %v180_v58, %v207_v23 }
  0xfb   :  { %v212_v28 = vsel %vm210_vm14, %v211_v24, %v209_v26  ;;  %v237_v29 = vsel %vm236_vm15, %v184_v59, %v235_v25 }
  0xfc   :  { %244 = vst [vmem:[%s370_s2 + $0x18] sm:$0xff] %v212_v28  ;;  %v240_v30 = vsel %vm238_vm0, %v239_v27, %v237_v29 }
  0xfd   :  { %248 = vst [vmem:[%s370_s2 + $0x38] sm:$0xff] %v240_v30 }

// kernel: vad_forward.3
= control target key start
LH: loop header
LB: loop body
LE: loop exit
PB: predicated region body
PF: predicated region fallthrough
CT: control target
= control target key end

     0   :  { %v5010_v3 = vmov 0.0   ;;  %vm3727_vm0 = vmmov 0   ;;  %s5002_s1 = inlined_call_operand.vmem [shape: f32[128,384], index: 1, kind: input, shape index: {}]   ;;  %s5003_s2 = inlined_call_operand.vmem [shape: f32[128,384], index: 2, kind: input, shape index: {}]   ;;  %s5004_s0 = inlined_call_operand.vmem [shape: f32[64,128], index: 0, kind: input, shape index: {}]   ;;  %s5005_s4 = inlined_call_operand.vmem [shape: f32[1,384], index: 4, kind: input, shape index: {}]   ;;  %s5006_s3 = inlined_call_operand.vmem [shape: f32[1,384], index: 3, kind: input, shape index: {}]   ;;  %s5007_s5 = inlined_call_operand.vmem [shape: f32[128,128], index: 5, kind: input, shape index: {}]   ;;  %s5008_s6 = inlined_call_operand.vmem [shape: f32[1,128], index: 6, kind: input, shape index: {}]   ;;  %s5009_s7 = inlined_call_operand.vmem [shape: f32[64,128], index: 7, kind: output, shape index: {}]  }
   0x1   :  { %v35_v0 = vld [vmem:[%s5002_s1 + $0x8] sm:$0xff]  ;;  %v38_v1 = vld [vmem:[%s5002_s1 + $0x20] sm:$0xff]  ;;  %163 = vmatprep.mubr.f32.mxu1 %v5010_v3  ;;  %476 = vmatprep.mubr.f32.mxu0 %v5010_v3  ;;  %v37_v5 = vld [vmem:[%s5002_s1 + $0x18] sm:$0xff] }
   0x2   :  { %v34_v2 = vld [vmem:[%s5002_s1] sm:$0xff]  ;;  %v3016_v4 = vpack.c.bf16 %v38_v1, %v35_v0  ;;  %v41_v6 = vld [vmem:[%s5002_s1 + $0x38] sm:$0xff]  ;;  %v44_v7 = vld [vmem:[%s5002_s1 + $0x50] sm:$0xff] }
   0x3   :  { %v3018_v8 = vpack.c.bf16 %v37_v5, %v34_v2  ;;  %v3020_v9 = vpack.c.bf16 %v44_v7, %v41_v6  ;;  %v348_v10 = vld [vmem:[%s5003_s2 + $0x8] sm:$0xff]  ;;  %v351_v11 = vld [vmem:[%s5003_s2 + $0x20] sm:$0xff]  ;;  %v40_v12 = vld [vmem:[%s5002_s1 + $0x30] sm:$0xff] }
   0x4   :  { %3017 = vmatprep.subr.bf16.mxu1 %v3016_v4  ;;  %v3797_v13 = vpack.c.bf16 %v351_v11, %v348_v10  ;;  %v43_v14 = vld [vmem:[%s5002_s1 + $0x48] sm:$0xff]  ;;  %v347_v15 = vld [vmem:[%s5003_s2] sm:$0xff]  ;;  %v350_v16 = vld [vmem:[%s5003_s2 + $0x18] sm:$0xff] }
   0x5   :  { %3019 = vmatpush1.bf16.msra.mxu1 %v3018_v8  ;;  %v3022_v17 = vpack.c.bf16 %v43_v14, %v40_v12  ;;  %v3808_v18 = vpack.c.bf16 %v350_v16, %v347_v15  ;;  %v47_v19 = vld [vmem:[%s5002_s1 + $0x68] sm:$0xff]  ;;  %v50_v20 = vld [vmem:[%s5002_s1 + $0x80] sm:$0xff]  ;;  %v354_v21 = vld [vmem:[%s5003_s2 + $0x38] sm:$0xff] }
   0x6   :  { %3021 = vmatprep.subr.bf16.mxu1 %v3020_v9  ;;  %3081 = vmatprep.subr.bf16.mxu0 %v3797_v13  ;;  %v3024_v22 = vpack.c.bf16 %v50_v20, %v47_v19  ;;  %v357_v23 = vld [vmem:[%s5003_s2 + $0x50] sm:$0xff]  ;;  %v46_v24 = vld [vmem:[%s5002_s1 + $0x60] sm:$0xff]  ;;  %v49_v25 = vld [vmem:[%s5002_s1 + $0x78] sm:$0xff] }
   0x7   :  { %3083 = vmatpush1.bf16.msra.mxu0 %v3808_v18  ;;  %v3830_v26 = vpack.c.bf16 %v357_v23, %v354_v21  ;;  %v353_v27 = vld [vmem:[%s5003_s2 + $0x30] sm:$0xff]  ;;  %v356_v28 = vld [vmem:[%s5003_s2 + $0x48] sm:$0xff]  ;;  %v53_v29 = vld [vmem:[%s5002_s1 + $0x98] sm:$0xff]  ;;  %v3026_v34 = vpack.c.bf16 %v49_v25, %v46_v24 }
   0x8   :  { %v3841_v30 = vpack.c.bf16 %v356_v28, %v353_v27  ;;  %v56_v31 = vld [vmem:[%s5002_s1 + $0xb0] sm:$0xff]  ;;  %v360_v32 = vld [vmem:[%s5003_s2 + $0x68] sm:$0xff]  ;;  %v363_v33 = vld [vmem:[%s5003_s2 + $0x80] sm:$0xff] }
   0x9   :  { %3023 = vmatpush1.bf16.msra.mxu1 %v3022_v17  ;;  %3085 = vmatprep.subr.bf16.mxu0 %v3830_v26  ;;  %v3853_v35 = vpack.c.bf16 %v363_v33, %v360_v32  ;;  %v52_v36 = vld [vmem:[%s5002_s1 + $0x90] sm:$0xff]  ;;  %v359_v37 = vld [vmem:[%s5003_s2 + $0x60] sm:$0xff]  ;;  %v3028_v38 = vpack.c.bf16 %v56_v31, %v53_v29  ;;  %v55_v39 = vld [vmem:[%s5002_s1 + $0xa8] sm:$0xff] }
   0xa   :  { %3025 = vmatprep.subr.bf16.mxu1 %v3024_v22  ;;  %v362_v40 = vld [vmem:[%s5003_s2 + $0x78] sm:$0xff]  ;;  %v59_v41 = vld [vmem:[%s5002_s1 + $0xc8] sm:$0xff]  ;;  %v62_v43 = vld [vmem:[%s5002_s1 + $0xe0] sm:$0xff]  ;;  %v3030_v49 = vpack.c.bf16 %v55_v39, %v52_v36 }
   0xb   :  { %3087 = vmatpush1.bf16.msra.mxu0 %v3841_v30  ;;  %v3871_v42 = vpack.c.bf16 %v362_v40, %v359_v37  ;;  %v366_v44 = vld [vmem:[%s5003_s2 + $0x98] sm:$0xff]  ;;  %v369_v45 = vld [vmem:[%s5003_s2 + $0xb0] sm:$0xff]  ;;  %v368_v48 = vld [vmem:[%s5003_s2 + $0xa8] sm:$0xff]  ;;  %v3032_v51 = vpack.c.bf16 %v62_v43, %v59_v41 }
   0xc   :  { %3089 = vmatprep.subr.bf16.mxu0 %v3853_v35  ;;  %v3883_v46 = vpack.c.bf16 %v369_v45, %v366_v44  ;;  %v365_v47 = vld [vmem:[%s5003_s2 + $0x90] sm:$0xff]  ;;  %v372_v50 = vld [vmem:[%s5003_s2 + $0xc8] sm:$0xff]  ;;  %v58_v52 = vld [vmem:[%s5002_s1 + $0xc0] sm:$0xff] }
   0xd   :  { %3027 = vmatpush1.bf16.msra.mxu1 %v3026_v34  ;;  %v61_v53 = vld [vmem:[%s5002_s1 + $0xd8] sm:$0xff]  ;;  %v375_v54 = vld [vmem:[%s5003_s2 + $0xe0] sm:$0xff]  ;;  %v3904_v55 = vpack.c.bf16 %v368_v48, %v365_v47  ;;  %v68_v57 = vld [vmem:[%s5002_s1 + $0x110] sm:$0xff] }
   0xe   :  { %3029 = vmatprep.subr.bf16.mxu1 %v3028_v38  ;;  %v65_v56 = vld [vmem:[%s5002_s1 + $0xf8] sm:$0xff]  ;;  %v3913_v58 = vpack.c.bf16 %v375_v54, %v372_v50  ;;  %v371_v59 = vld [vmem:[%s5003_s2 + $0xc0] sm:$0xff]  ;;  %v3034_v61 = vpack.c.bf16 %v61_v53, %v58_v52  ;;  %v381_v63 = vld [vmem:[%s5003_s2 + $0x110] sm:$0xff] }
   0xf   :  { %3091 = vmatpush1.bf16.msra.mxu0 %v3871_v42  ;;  %v374_v60 = vld [vmem:[%s5003_s2 + $0xd8] sm:$0xff]  ;;  %v3036_v0 = vpack.c.bf16 %v68_v57, %v65_v56  ;;  %v64_v1 = vld [vmem:[%s5002_s1 + $0xf0] sm:$0xff]  ;;  %v67_v2 = vld [vmem:[%s5002_s1 + $0x108] sm:$0xff] }
  0x10   :  { %3093 = vmatprep.subr.bf16.mxu0 %v3883_v46  ;;  %v378_v62 = vld [vmem:[%s5003_s2 + $0xf8] sm:$0xff]  ;;  %v3934_v4 = vpack.c.bf16 %v374_v60, %v371_v59  ;;  %v71_v5 = vld [vmem:[%s5002_s1 + $0x128] sm:$0xff]  ;;  %v74_v6 = vld [vmem:[%s5002_s1 + $0x140] sm:$0xff]  ;;  %v3038_v10 = vpack.c.bf16 %v67_v2, %v64_v1 }
  0x11   :  { %3031 = vmatpush1.bf16.msra.mxu1 %v3030_v49  ;;  %v3943_v7 = vpack.c.bf16 %v381_v63, %v378_v62  ;;  %v377_v8 = vld [vmem:[%s5003_s2 + $0xf0] sm:$0xff]  ;;  %v380_v9 = vld [vmem:[%s5003_s2 + $0x108] sm:$0xff]  ;;  %v387_v12 = vld [vmem:[%s5003_s2 + $0x140] sm:$0xff]  ;;  %v3040_v14 = vpack.c.bf16 %v74_v6, %v71_v5 }
  0x12   :  { %3033 = vmatprep.subr.bf16.mxu1 %v3032_v51  ;;  %v384_v11 = vld [vmem:[%s5003_s2 + $0x128] sm:$0xff]  ;;  %v70_v15 = vld [vmem:[%s5002_s1 + $0x120] sm:$0xff]  ;;  %v73_v16 = vld [vmem:[%s5002_s1 + $0x138] sm:$0xff]  ;;  %v3964_v17 = vpack.c.bf16 %v380_v9, %v377_v8 }
  0x13   :  { %3095 = vmatpush1.bf16.msra.mxu0 %v3904_v55  ;;  %v77_v19 = vld [vmem:[%s5002_s1 + $0x158] sm:$0xff]  ;;  %v80_v20 = vld [vmem:[%s5002_s1 + $0x170] sm:$0xff]  ;;  %v3973_v21 = vpack.c.bf16 %v387_v12, %v384_v11  ;;  %v383_v22 = vld [vmem:[%s5003_s2 + $0x120] sm:$0xff]  ;;  %v3042_v24 = vpack.c.bf16 %v73_v16, %v70_v15 }
  0x14   :  { %3097 = vmatprep.subr.bf16.mxu0 %v3913_v58  ;;  %v386_v23 = vld [vmem:[%s5003_s2 + $0x138] sm:$0xff]  ;;  %v393_v27 = vld [vmem:[%s5003_s2 + $0x170] sm:$0xff]  ;;  %v3044_v28 = vpack.c.bf16 %v80_v20, %v77_v19  ;;  %v79_v31 = vld [vmem:[%s5002_s1 + $0x168] sm:$0xff]  ;;  %v5012_v20 = vmov 0.0|0.0  }
  0x15   :  { %3035 = vmatpush1.bf16.msra.mxu1 %v3034_v61  ;;  %v390_v25 = vld [vmem:[%s5003_s2 + $0x158] sm:$0xff]  ;;  %v76_v29 = vld [vmem:[%s5002_s1 + $0x150] sm:$0xff]  ;;  %v3994_v32 = vpack.c.bf16 %v386_v23, %v383_v22  ;;  %v39_v34 = vld [vmem:[%s5002_s1 + $0x28] sm:$0xff] }
  0x16   :  { %3037 = vmatprep.subr.bf16.mxu1 %v3036_v0  ;;  %v36_v33 = vld [vmem:[%s5002_s1 + $0x10] sm:$0xff]  ;;  %v4003_v36 = vpack.c.bf16 %v393_v27, %v390_v25  ;;  %v392_v38 = vld [vmem:[%s5003_s2 + $0x168] sm:$0xff]  ;;  %v3046_v39 = vpack.c.bf16 %v79_v31, %v76_v29  ;;  %v42_v43 = vld [vmem:[%s5002_s1 + $0x40] sm:$0xff] }
  0x17   :  { %3099 = vmatpush1.bf16.msra.mxu0 %v3934_v4  ;;  %v389_v37 = vld [vmem:[%s5003_s2 + $0x150] sm:$0xff]  ;;  %v3048_v40 = vpack.c.bf16 %v39_v34, %v36_v33  ;;  %v45_v44 = vld [vmem:[%s5002_s1 + $0x58] sm:$0xff]  ;;  %v4024_v45 = vld [vmem:[%s5004_s0] sm:$0xff] }
  0x18   :  { %3101 = vmatprep.subr.bf16.mxu0 %v3943_v7  ;;  %v4012_v41 = vpack.c.bf16 %v392_v38, %v389_v37  ;;  %v3052_v47 = vpack.c.bf16 %v45_v44, %v42_v43  ;;  %v48_v48 = vld [vmem:[%s5002_s1 + $0x70] sm:$0xff]  ;;  %v51_v49 = vld [vmem:[%s5002_s1 + $0x88] sm:$0xff]  ;;  %v54_v52 = vld [vmem:[%s5002_s1 + $0xa0] sm:$0xff] }
  0x19   :  { %3039 = vmatpush1.bf16.msra.mxu1 %v3038_v10  ;;  %v4039_v50 = vld [vmem:[%s5004_s0 + $0x8] sm:$0xff]  ;;  %v3056_v51 = vpack.c.bf16 %v51_v49, %v48_v48  ;;  %v57_v53 = vld [vmem:[%s5002_s1 + $0xb8] sm:$0xff]  ;;  %v4056_v54 = vld [vmem:[%s5004_s0 + $0x10] sm:$0xff] }
  0x1a   :  { %3041 = vmatprep.subr.bf16.mxu1 %v3040_v14  ;;  %v3060_v56 = vpack.c.bf16 %v57_v53, %v54_v52  ;;  %v60_v57 = vld [vmem:[%s5002_s1 + $0xd0] sm:$0xff]  ;;  %v63_v59 = vld [vmem:[%s5002_s1 + $0xe8] sm:$0xff]  ;;  %v29_v60 = vld [vmem:[%s5004_s0 + $0x18] sm:$0xff] }
  0x1b   :  { %3103 = vmatpush1.bf16.msra.mxu0 %v3964_v17  ;;  %v3064_v61 = vpack.c.bf16 %v63_v59, %v60_v57  ;;  %v66_v62 = vld [vmem:[%s5002_s1 + $0x100] sm:$0xff]  ;;  %v69_v63 = vld [vmem:[%s5002_s1 + $0x118] sm:$0xff]  ;;  %v72_v2 = vld [vmem:[%s5002_s1 + $0x130] sm:$0xff] }
  0x1c   :  { %3105 = vmatprep.subr.bf16.mxu0 %v3973_v21  ;;  %v30_v0 = vld [vmem:[%s5004_s0 + $0x20] sm:$0xff]  ;;  %v3068_v1 = vpack.c.bf16 %v69_v63, %v66_v62  ;;  %v75_v5 = vld [vmem:[%s5002_s1 + $0x148] sm:$0xff]  ;;  %v81_v10 = vld [vmem:[%s5002_s1 + $0x178] sm:$0xff] }
  0x1d   :  { %3043 = vmatpush1.bf16.msra.mxu1 %v3042_v24  ;;  %v31_v6 = vld [vmem:[%s5004_s0 + $0x28] sm:$0xff]  ;;  %v3072_v8 = vpack.c.bf16 %v75_v5, %v72_v2  ;;  %v78_v9 = vld [vmem:[%s5002_s1 + $0x160] sm:$0xff]  ;;  %v32_v11 = vld [vmem:[%s5004_s0 + $0x30] sm:$0xff] }
  0x1e   :  { %3045 = vmatprep.subr.bf16.mxu1 %v3044_v28  ;;  %v3076_v12 = vpack.c.bf16 %v81_v10, %v78_v9  ;;  %v33_v14 = vld [vmem:[%s5004_s0 + $0x38] sm:$0xff]  ;;  %v349_v15 = vld [vmem:[%s5003_s2 + $0x10] sm:$0xff]  ;;  %v352_v16 = vld [vmem:[%s5003_s2 + $0x28] sm:$0xff] }
  0x1f   :  { %3107 = vmatpush1.bf16.msra.mxu0 %v3994_v32  ;;  %v4122_v19 = vpack.c.bf16 %v352_v16, %v349_v15  ;;  %v355_v22 = vld [vmem:[%s5003_s2 + $0x40] sm:$0xff]  ;;  %v358_v23 = vld [vmem:[%s5003_s2 + $0x58] sm:$0xff]  ;;  %v361_v25 = vld [vmem:[%s5003_s2 + $0x70] sm:$0xff] }
  0x20   :  { %3109 = vmatprep.subr.bf16.mxu0 %v4003_v36  ;;  %v4135_v24 = vpack.c.bf16 %v358_v23, %v355_v22  ;;  %v364_v27 = vld [vmem:[%s5003_s2 + $0x88] sm:$0xff]  ;;  %v367_v28 = vld [vmem:[%s5003_s2 + $0xa0] sm:$0xff]  ;;  %v370_v29 = vld [vmem:[%s5003_s2 + $0xb8] sm:$0xff] }
  0x21   :  { %3047 = vmatpush1.bf16.msra.mxu1 %v3046_v39  ;;  %v4156_v31 = vpack.c.bf16 %v370_v29, %v367_v28  ;;  %v373_v33 = vld [vmem:[%s5003_s2 + $0xd0] sm:$0xff]  ;;  %v376_v34 = vld [vmem:[%s5003_s2 + $0xe8] sm:$0xff]  ;;  %v379_v38 = vld [vmem:[%s5003_s2 + $0x100] sm:$0xff] }
  0x22   :  { %3049 = vmatprep.subr.bf16.mxu1 %v3048_v40  ;;  %v4166_v37 = vpack.c.bf16 %v376_v34, %v373_v33  ;;  %v382_v39 = vld [vmem:[%s5003_s2 + $0x118] sm:$0xff]  ;;  %v385_v43 = vld [vmem:[%s5003_s2 + $0x130] sm:$0xff]  ;;  %v388_v44 = vld [vmem:[%s5003_s2 + $0x148] sm:$0xff] }
  0x23   :  { %3111 = vmatpush1.bf16.msra.mxu0 %v4012_v41  ;;  %v394_v48 = vld [vmem:[%s5003_s2 + $0x178] sm:$0xff]  ;;  %v4226_v53 = vld [vmem:[%s5005_s4] sm:$0x7] }
  0x24   :  { %164 = vmatmul.mubr.f32.vlgmr.msra.gmra.mrb[0].mxu1 %v4024_v45  ;;  %3137 = vmatprep.subr.bf16.mxu0 %v3797_v13  ;;  %v4244_v59 = vld [vmem:[%s5005_s4] sm:$0x7] }
  0x25   :  { %3051 = vmatpush3.bf16.msra.mxu1 %v3048_v40  ;;  %169 = vmatprep.mubr.f32.mxu1 %v5010_v3  ;;  %v4178_v40 = vpack.c.bf16 %v382_v39, %v379_v38  ;;  %v4258_v63 = vld [vmem:[%s5005_s4] sm:$0x7] }
  0x26   :  { %3053 = vmatprep.subr.bf16.mxu1 %v3052_v47  ;;  %477 = vmatmul.mubr.f32.vlgmr.msra.gmra.mrb[0].mxu0 %v5010_v3  ;;  %v4272_v5 = vld [vmem:[%s5005_s4] sm:$0x7] }
  0x27   :  { %3139 = vmatpush1.bf16.msra.mxu0 %v3808_v18  ;;  %710 = vmatprep.mubr.f32.mxu0 %v5010_v3  ;;  %v4282_v9 = vld [vmem:[%s5006_s3] sm:$0x7] }
  0x28   :  { %170 = vmatmul.mubr.f32.gmra.mrb[2].mxu1 %v4039_v50  ;;  %3141 = vmatprep.subr.bf16.mxu0 %v3830_v26  ;;  %v4287_v10 = vld [vmem:[%s5005_s4] sm:$0x7] }
  0x29   :  { %3055 = vmatpush3.bf16.msra.mxu1 %v3052_v47  ;;  %175 = vmatprep.mubr.f32.mxu1 %v5010_v3  ;;  %v391_v47 = vld [vmem:[%s5003_s2 + $0x160] sm:$0xff] }
  0x2a   :  { %3057 = vmatprep.subr.bf16.mxu1 %v3056_v51  ;;  %v4198_v49 = vpack.c.bf16 %v394_v48, %v391_v47 }
  0x2b   :  { %3143 = vmatpush1.bf16.msra.mxu0 %v3841_v30 }
  0x2c   :  { %176 = vmatmul.mubr.f32.gmra.mrb[4].mxu1 %v4056_v54  ;;  %3145 = vmatprep.subr.bf16.mxu0 %v3853_v35 }
  0x2d   :  { %3059 = vmatpush3.bf16.msra.mxu1 %v3056_v51  ;;  %181 = vmatprep.mubr.f32.mxu1 %v5010_v3 }
  0x2e   :  { %3061 = vmatprep.subr.bf16.mxu1 %v3060_v56 }
  0x2f   :  { %3147 = vmatpush1.bf16.msra.mxu0 %v3871_v42 }
  0x30   :  { %182 = vmatmul.mubr.f32.gmra.mrb[6].mxu1 %v29_v60  ;;  %3149 = vmatprep.subr.bf16.mxu0 %v3883_v46 }
  0x31   :  { %3063 = vmatpush3.bf16.msra.mxu1 %v3060_v56  ;;  %187 = vmatprep.mubr.f32.mxu1 %v5010_v3  ;;  %v4235_v56 = vld [vmem:[%s5005_s4] sm:$0x7] }
  0x32   :  { %3065 = vmatprep.subr.bf16.mxu1 %v3064_v61 }
  0x33   :  { %3151 = vmatpush1.bf16.msra.mxu0 %v3904_v55 }
  0x34   :  { %188 = vmatmul.mubr.f32.gmra.mrb[8].mxu1 %v30_v0  ;;  %3153 = vmatprep.subr.bf16.mxu0 %v3913_v58 }
  0x35   :  { %3067 = vmatpush3.bf16.msra.mxu1 %v3064_v61  ;;  %193 = vmatprep.mubr.f32.mxu1 %v5010_v3  ;;  %v4251_v61 = vld [vmem:[%s5005_s4] sm:$0x7] }
  0x36   :  { %3069 = vmatprep.subr.bf16.mxu1 %v3068_v1 }
  0x37   :  { %3155 = vmatpush1.bf16.msra.mxu0 %v3934_v4 }
  0x38   :  { %194 = vmatmul.mubr.f32.gmra.mrb[10].mxu1 %v31_v6  ;;  %3157 = vmatprep.subr.bf16.mxu0 %v3943_v7 }
  0x39   :  { %3071 = vmatpush3.bf16.msra.mxu1 %v3068_v1  ;;  %199 = vmatprep.mubr.f32.mxu1 %v5010_v3  ;;  %v4265_v1 = vld [vmem:[%s5005_s4] sm:$0x7] }
  0x3a   :  { %3073 = vmatprep.subr.bf16.mxu1 %v3072_v8 }
  0x3b   :  { %3159 = vmatpush1.bf16.msra.mxu0 %v3964_v17 }
  0x3c   :  { %200 = vmatmul.mubr.f32.gmra.mrb[12].mxu1 %v32_v11  ;;  %3161 = vmatprep.subr.bf16.mxu0 %v3973_v21 }
  0x3d   :  { %3075 = vmatpush3.bf16.msra.mxu1 %v3072_v8  ;;  %205 = vmatprep.mubr.f32.mxu1 %v5010_v3 }
  0x3e   :  { %3077 = vmatprep.subr.bf16.mxu1 %v3076_v12 }
  0x3f   :  { %3163 = vmatpush1.bf16.msra.mxu0 %v3994_v32 }
  0x40   :  { %206 = vmatmul.mubr.f32.gmra.mrb[14].mxu1 %v33_v14  ;;  %3165 = vmatprep.subr.bf16.mxu0 %v4003_v36 }
  0x41   :  { %3079 = vmatpush3.bf16.msra.mxu1 %v3076_v12  ;;  %2680 = vmatprep.mubr.f32.mxu1 %v4024_v45  ;;  %v4188_v45 = vpack.c.bf16 %v388_v44, %v385_v43 }
  0x42   :  { %3112 = vmatprep.subr.bf16.mxu1 %v5012_v20 }
  0x43   :  { %3167 = vmatpush1.bf16.msra.mxu0 %v4012_v41 }
  0x44   :  { %2681 = vmatmul.mubr.f32.vlgmr.msra.gmra.mrb[16].mxu1 %v4039_v50  ;;  %3193 = vmatprep.subr.bf16.mxu0 %v3797_v13  ;;  %v4146_v13 = vpack.c.bf16 %v364_v27, %v361_v25  ;;  %v84_v50 = vlaneseq }
  0x45   :  { %3114 = vmatpush3.bf16.msra.mxu1 %v4122_v19  ;;  %2683 = vmatprep.mubr.f32.mxu1 %v4056_v54 }
  0x46   :  { %3115 = vmatprep.subr.bf16.mxu1 %v5012_v20  ;;  %v4216_v51 = vshrl.u32 %v84_v50, 7 }
  0x48   :  { %2684 = vmatmul.mubr.f32.gmra.mrb[18].mxu1 %v29_v60  ;;  %v4221_v52 = vsub.s32 1, %v4216_v51  ;;  %v4277_v8 = vsub.s32 0, %v4216_v51 }
  0x49   :  { %3117 = vmatpush3.bf16.msra.mxu1 %v4135_v24  ;;  %2686 = vmatprep.mubr.f32.mxu1 %v30_v0 }
  0x4a   :  { %3118 = vmatprep.subr.bf16.mxu1 %v5012_v20  ;;  %v638_v54 = vrot.slane %v4226_v53, %v4221_v52  ;;  %v873_v57 = vrot.slane %v4235_v56, %v4221_v52  ;;  %v1108_v60 = vrot.slane %v4244_v59, %v4221_v52  ;;  %v1343_v62 = vrot.slane %v4251_v61, %v4221_v52 }
  0x4b   :  { %v1578_v0 = vrot.slane %v4258_v63, %v4221_v52  ;;  %v91_v12 = vrot.slane %v4282_v9, %v4221_v52  ;;  %v404_v16 = vrot.slane %v4287_v10, %v4221_v52  ;;  %v634_v33 = vrot.slane %v4226_v53, %v4277_v8 }
  0x4c   :  { %2687 = vmatmul.mubr.f32.gmra.mrb[20].mxu1 %v31_v6 }
  0x4d   :  { %3120 = vmatpush3.bf16.msra.mxu1 %v4146_v13  ;;  %2689 = vmatprep.mubr.f32.mxu1 %v32_v11  ;;  %v87_v11 = vrot.slane %v4282_v9, %v4277_v8 }
  0x4e   :  { %3121 = vmatprep.subr.bf16.mxu1 %v5012_v20 }
  0x50   :  { %2690 = vmatmul.mubr.f32.gmra.mrb[22].mxu1 %v33_v14  ;;  %v400_v14 = vrot.slane %v4287_v10, %v4277_v8 }
  0x51   :  { %3123 = vmatpush3.bf16.msra.mxu1 %v4156_v31  ;;  %2724 = vmatprep.mubr.msk.f32.mxu1 %vm3727_vm0, %v5010_v3 }
  0x52   :  { %3124 = vmatprep.subr.bf16.mxu1 %v5012_v20 }
  0x55   :  { %3126 = vmatpush3.bf16.msra.mxu1 %v4166_v37 }
  0x56   :  { %3127 = vmatprep.subr.bf16.mxu1 %v5012_v20 }
  0x59   :  { %3129 = vmatpush3.bf16.msra.mxu1 %v4178_v40 }
  0x5a   :  { %3130 = vmatprep.subr.bf16.mxu1 %v5012_v20 }
  0x5d   :  { %3132 = vmatpush3.bf16.msra.mxu1 %v4188_v45 }
  0x5e   :  { %3133 = vmatprep.subr.bf16.mxu1 %v5012_v20 }
  0x61   :  { %3135 = vmatpush3.bf16.msra.mxu1 %v4198_v49 }
  0x62   :  { %3168 = vmatprep.subr.bf16.mxu1 %v5012_v20 }
  0x64   :  { %2725 = vmatmul.mubr.f32.vlgmr.msra.gmra.mrb[24].mxu1 %v5010_v3 }
  0x65   :  { %3170 = vmatpush3.bf16.msra.mxu1 %v4122_v19  ;;  %2759 = vmatprep.mubr.msk.f32.mxu1 %vm3727_vm0, %v5010_v3 }
  0x66   :  { %3171 = vmatprep.subr.bf16.mxu1 %v5012_v20 }
  0x69   :  { %3173 = vmatpush3.bf16.msra.mxu1 %v4135_v24 }
  0x6a   :  { %3174 = vmatprep.subr.bf16.mxu1 %v5012_v20 }
  0x6d   :  { %3176 = vmatpush3.bf16.msra.mxu1 %v4146_v13 }
  0x6e   :  { %3177 = vmatprep.subr.bf16.mxu1 %v5012_v20 }
  0x71   :  { %3179 = vmatpush3.bf16.msra.mxu1 %v4156_v31 }
  0x72   :  { %3180 = vmatprep.subr.bf16.mxu1 %v5012_v20 }
  0x75   :  { %3182 = vmatpush3.bf16.msra.mxu1 %v4166_v37 }
  0x76   :  { %3183 = vmatprep.subr.bf16.mxu1 %v5012_v20 }
  0x79   :  { %3185 = vmatpush3.bf16.msra.mxu1 %v4178_v40 }
  0x7a   :  { %3186 = vmatprep.subr.bf16.mxu1 %v5012_v20 }
  0x7d   :  { %3188 = vmatpush3.bf16.msra.mxu1 %v4188_v45 }
  0x7e   :  { %3189 = vmatprep.subr.bf16.mxu1 %v5012_v20 }
  0x81   :  { %3191 = vmatpush3.bf16.msra.mxu1 %v4198_v49 }
  0x82   :  { %3224 = vmatprep.subr.bf16.mxu1 %v5012_v20 }
  0xf7   :  { %v165_v15 = vpop.f32.mrb[0].mxu1 }
  0xf8   :  { %v166_v22 = vadd.f32 %v165_v15, %v87_v11  ;;  %v167_v23 = vpop.f32.mrb[1].mxu1  ;;  %v869_v15 = vrot.slane %v4235_v56, %v4277_v8 }
  0xf9   :  { %v168_v25 = vadd.f32 %v167_v23, %v91_v12  ;;  %v478_v27 = vpop.f32.mrb[0].mxu0 }
  0xfa   :  { %v3561_v28 = vadd.f32 %v400_v14, %v166_v22  ;;  %v480_v29 = vpop.f32.mrb[1].mxu0 }
  0xfb   :  { %v171_v34 = vpop.f32.mrb[2].mxu1  ;;  %v3564_v38 = vadd.f32 %v404_v16, %v168_v25  ;;  %v1104_v16 = vrot.slane %v4244_v59, %v4277_v8 }
  0xfc   :  { %v172_v39 = vadd.f32 %v171_v34, %v87_v11  ;;  %v3562_v43 = vadd.f32 %v3561_v28, %v478_v27  ;;  %v173_v44 = vpop.f32.mrb[3].mxu1 }
  0xfd   :  { %v174_v47 = vadd.f32 %v173_v44, %v91_v12  ;;  %v3565_v48 = vadd.f32 %v3564_v38, %v480_v29 }
  0xfe   :  { %v4299_v50 = vadd.f32 %v634_v33, %v172_v39 }
  0xff   :  { %v177_v3 = vpop.f32.mrb[4].mxu1  ;;  %v4303_v23 = vadd.f32 %v638_v54, %v174_v47  ;;  %v1339_v54 = vrot.slane %v4251_v61, %v4277_v8 }
 0x100   :  { %v178_v14 = vadd.f32 %v177_v3, %v87_v11  ;;  %v179_v22 = vpop.f32.mrb[5].mxu1 }
 0x101   :  { %v180_v20 = vadd.f32 %v179_v22, %v91_v12 }
 0x102   :  { %v4305_v6 = vadd.f32 %v869_v15, %v178_v14 }
 0x103   :  { %v183_v25 = vpop.f32.mrb[6].mxu1  ;;  %v4309_v27 = vadd.f32 %v873_v57, %v180_v20  ;;  %v1574_v20 = vrot.slane %v4258_v63, %v4277_v8 }
 0x104   :  { %v184_v28 = vadd.f32 %v183_v25, %v87_v11  ;;  %v185_v29 = vpop.f32.mrb[7].mxu1 }
 0x105   :  { %v186_v33 = vadd.f32 %v185_v29, %v91_v12 }
 0x106   :  { %v4311_v34 = vadd.f32 %v1104_v16, %v184_v28 }
 0x107   :  { %v189_v38 = vpop.f32.mrb[8].mxu1  ;;  %v4315_v3 = vadd.f32 %v1108_v60, %v186_v33  ;;  %v1809_v60 = vrot.slane %v4265_v1, %v4277_v8 }
 0x108   :  { %v190_v39 = vadd.f32 %v189_v38, %v87_v11  ;;  %v191_v44 = vpop.f32.mrb[9].mxu1 }
 0x109   :  { %v192_v47 = vadd.f32 %v191_v44, %v91_v12 }
 0x10a   :  { %v4317_v15 = vadd.f32 %v1339_v54, %v190_v39  ;;  %v4330_v39 = vsub.s32 2, %v4216_v51 }
 0x10b   :  { %v195_v57 = vpop.f32.mrb[10].mxu1  ;;  %v4321_v14 = vadd.f32 %v1343_v62, %v192_v47  ;;  %v2044_v62 = vrot.slane %v4272_v5, %v4277_v8 }
 0x10c   :  { %v196_v22 = vadd.f32 %v195_v57, %v87_v11  ;;  %v197_v16 = vpop.f32.mrb[11].mxu1 }
 0x10d   :  { %v198_v25 = vadd.f32 %v197_v16, %v91_v12  ;;  %v95_v16 = vrot.slane %v4282_v9, %v4330_v39 }
 0x10e   :  { %v4323_v28 = vadd.f32 %v1574_v20, %v196_v22  ;;  %v5014_v20 = vrot.slane %v4265_v1, %v4221_v52  ;;  %v2447_v1 = vmul.f32 -1.442695, %v3562_v43 }
 0x10f   :  { %v201_v29 = vpop.f32.mrb[12].mxu1  ;;  %v4327_v33 = vadd.f32 %v1578_v0, %v198_v25 }
 0x110   :  { %v202_v38 = vadd.f32 %v201_v29, %v87_v11  ;;  %v203_v54 = vpop.f32.mrb[13].mxu1  ;;  %3611 = vpow2.f32 %v2447_v1  ;;  %v408_v1 = vrot.slane %v4287_v10, %v4330_v39  ;;  %v5021_v10 = vmov 0.0|0.0  }
 0x111   :  { %v204_v44 = vadd.f32 %v203_v54, %v91_v12 }
 0x112   :  { %v4332_v2 = vadd.f32 %v1809_v60, %v202_v38  ;;  %v5017_v60 = vrot.slane %v4272_v5, %v4221_v52 }
 0x113   :  { %v207_v47 = vpop.f32.mrb[14].mxu1  ;;  %v4339_v57 = vadd.f32 %v5014_v20, %v204_v44 }
 0x114   :  { %v208_v22 = vadd.f32 %v207_v47, %v87_v11  ;;  %v209_v0 = vpop.f32.mrb[15].mxu1 }
 0x115   :  { %5015 = vst [vmem:[#allocation4_spill] sm:$0xff] %v4339_v57  ;;  %v210_v25 = vadd.f32 %v209_v0, %v91_v12 }
 0x116   :  { %v4343_v51 = vadd.f32 %v2044_v62, %v208_v22 }
 0x117   :  { %v2682_v29 = vpop.f32.mrb[16].mxu1  ;;  %v4348_v38 = vadd.f32 %v5017_v60, %v210_v25  ;;  %v2448_v25 = vmul.f32 -1.442695, %v3565_v48 }
 0x118   :  { %5016 = vst [vmem:[#allocation5_spill] sm:$0xff] %v4343_v51  ;;  %v4350_v8 = vadd.f32 %v2682_v29, %v95_v16  ;;  %v278_v54 = vpop.f32.mrb[17].mxu1 }
 0x119   :  { %5018 = vst [vmem:[#allocation6_spill] sm:$0xff] %v4348_v38  ;;  %3613 = vpow2.f32 %v2448_v25 }
 0x11a   :  { %v3612_v43 = vpop.eup %3611 }
 0x11b   :  { %v2685_v44 = vpop.f32.mrb[18].mxu1  ;;  %v557_v60 = vadd.f32 1.0, %v3612_v43 }
 0x11c   :  { %v4352_v20 = vadd.f32 %v2685_v44, %v95_v16  ;;  %v288_v11 = vpop.f32.mrb[19].mxu1 }
 0x11d   :  { %v4354_v47 = vadd.f32 %v288_v11, %v95_v16  ;;  %3615 = vrcp.f32 %v557_v60 }
 0x11f   :  { %v2688_v9 = vpop.f32.mrb[20].mxu1 }
 0x120   :  { %v4356_v12 = vadd.f32 %v2688_v9, %v95_v16  ;;  %v298_v62 = vpop.f32.mrb[21].mxu1 }
 0x121   :  { %v4358_v22 = vadd.f32 %v298_v62, %v95_v16 }
 0x123   :  { %v2691_v52 = vpop.f32.mrb[22].mxu1  ;;  %v3614_v44 = vpop.eup %3613 }
 0x124   :  { %v4360_v5 = vadd.f32 %v2691_v52, %v95_v16  ;;  %v308_v0 = vpop.f32.mrb[23].mxu1  ;;  %v564_v11 = vadd.f32 1.0, %v3614_v44  ;;  %v279_v52 = vadd.f32 %v278_v54, %v95_v16  ;;  %v1060_v44 = vld [vmem:[%s5003_s2 + $0x48] sm:$0xff] }
 0x125   :  { %v4362_v29 = vadd.f32 %v308_v0, %v95_v16 }
 0x126   :  { %5019 = vst [vmem:[#allocation7_spill] sm:$0xff] %v4360_v5  ;;  %3617 = vrcp.f32 %v564_v11  ;;  %v1064_v11 = vld [vmem:[%s5003_s2 + $0x68] sm:$0xff] }
 0x127   :  { %5020 = vst [vmem:[#allocation8_spill] sm:$0xff] %v4362_v29  ;;  %v3616_v51 = vpop.eup %3615 }
 0x130   :  { %v3618_v48 = vpop.eup %3617 }
 0x131   :  { %v570_v0 = vsub.f32 1.0, %v3618_v48  ;;  %v572_v43 = vmul.f32 0.0, %v3618_v48  ;;  %v1066_v48 = vld [vmem:[%s5003_s2 + $0x78] sm:$0xff] }
 0x137   :  { %v549_v9 = vpop.f32.mrb[24].mxu1 }
 0x138   :  { %v550_v38 = vadd.f32 %v549_v9, %v408_v1  ;;  %v2726_v62 = vpop.f32.mrb[25].mxu1  ;;  %v1067_v9 = vld [vmem:[%s5003_s2 + $0x80] sm:$0xff] }
 0x139   :  { %v4475_v62 = vpack.c.bf16 %v1067_v9, %v1064_v11 }
 0x13a   :  { %v567_v5 = vmul.f32 %v3616_v51, %v550_v38 }
 0x13c   :  { %v568_v57 = vadd.f32 %v567_v5, %v279_v52  ;;  %v1063_v52 = vld [vmem:[%s5003_s2 + $0x60] sm:$0xff] }
 0x13e   :  { %3619 = vtanh.f32 %v568_v57  ;;  %v5022_v57 = vmov 0.0  }
 0x148   :  { %v3620_v29 = vpop.eup %3619 }
 0x149   :  { %v571_v25 = vmul.f32 %v3620_v29, %v570_v0  ;;  %v1057_v29 = vld [vmem:[%s5003_s2 + $0x30] sm:$0xff]  ;;  %v4483_v0 = vpack.c.bf16 %v1066_v48, %v1063_v52 }
 0x14a   :  { %v4465_v1 = vpack.c.bf16 %v1060_v44, %v1057_v29  ;;  %v877_v29 = vrot.slane %v4235_v56, %v4330_v39 }
 0x14b   :  { %v4366_v60 = vadd.f32 %v572_v43, %v571_v25  ;;  %v1070_v25 = vld [vmem:[%s5003_s2 + $0x98] sm:$0xff]  ;;  %v1073_v43 = vld [vmem:[%s5003_s2 + $0xb0] sm:$0xff] }
 0x14d   :  { %711 = vmatmul.mubr.f32.vlgmr.msra.gmra.mrb[2].mxu0 %v4366_v60  ;;  %2760 = vmatmul.mubr.f32.vlgmr.msra.gmra.mrb[26].mxu1 %v4366_v60 }
 0x14e   :  { %3195 = vmatpush1.bf16.msra.mxu0 %v3808_v18  ;;  %3226 = vmatpush3.bf16.msra.mxu1 %v4122_v19  ;;  %v642_v18 = vrot.slane %v4226_v53, %v4330_v39 }
 0x14f   :  { %3197 = vmatprep.subr.bf16.mxu0 %v3830_v26  ;;  %3227 = vmatprep.subr.bf16.mxu1 %v5021_v10 }
 0x150   :  { %945 = vmatprep.mubr.f32.mxu0 %v5022_v57  ;;  %2794 = vmatprep.mubr.msk.f32.mxu1 %vm3727_vm0, %v5022_v57 }
 0x152   :  { %3199 = vmatpush1.bf16.msra.mxu0 %v3841_v30  ;;  %3229 = vmatpush3.bf16.msra.mxu1 %v4135_v24 }
 0x153   :  { %3201 = vmatprep.subr.bf16.mxu0 %v3853_v35  ;;  %3230 = vmatprep.subr.bf16.mxu1 %v5021_v10 }
 0x156   :  { %3203 = vmatpush1.bf16.msra.mxu0 %v3871_v42  ;;  %3232 = vmatpush3.bf16.msra.mxu1 %v4146_v13 }
 0x157   :  { %3205 = vmatprep.subr.bf16.mxu0 %v3883_v46  ;;  %3233 = vmatprep.subr.bf16.mxu1 %v5021_v10 }
 0x15a   :  { %3207 = vmatpush1.bf16.msra.mxu0 %v3904_v55  ;;  %3235 = vmatpush3.bf16.msra.mxu1 %v4156_v31 }
 0x15b   :  { %3209 = vmatprep.subr.bf16.mxu0 %v3913_v58  ;;  %3236 = vmatprep.subr.bf16.mxu1 %v5021_v10 }
 0x15e   :  { %3211 = vmatpush1.bf16.msra.mxu0 %v3934_v4  ;;  %3238 = vmatpush3.bf16.msra.mxu1 %v4166_v37 }
 0x15f   :  { %3213 = vmatprep.subr.bf16.mxu0 %v3943_v7  ;;  %3239 = vmatprep.subr.bf16.mxu1 %v5021_v10 }
 0x162   :  { %3215 = vmatpush1.bf16.msra.mxu0 %v3964_v17  ;;  %3241 = vmatpush3.bf16.msra.mxu1 %v4178_v40 }
 0x163   :  { %3217 = vmatprep.subr.bf16.mxu0 %v3973_v21  ;;  %3242 = vmatprep.subr.bf16.mxu1 %v5021_v10 }
 0x166   :  { %3219 = vmatpush1.bf16.msra.mxu0 %v3994_v32  ;;  %3244 = vmatpush3.bf16.msra.mxu1 %v4188_v45 }
 0x167   :  { %3221 = vmatprep.subr.bf16.mxu0 %v4003_v36  ;;  %3245 = vmatprep.subr.bf16.mxu1 %v5021_v10 }
 0x16a   :  { %3223 = vmatpush1.bf16.msra.mxu0 %v4012_v41  ;;  %3247 = vmatpush3.bf16.msra.mxu1 %v4198_v49 }
 0x16b   :  { %3280 = vmatprep.subr.bf16.mxu1 %v5021_v10 }
 0x220   :  { %v712_v26 = vpop.f32.mrb[2].mxu0  ;;  %v783_v30 = vpop.f32.mrb[26].mxu1 }
 0x221   :  { %v3568_v35 = vadd.f32 %v4299_v50, %v712_v26  ;;  %v784_v42 = vadd.f32 %v783_v30, %v642_v18  ;;  %v714_v46 = vpop.f32.mrb[3].mxu0  ;;  %v2761_v55 = vpop.f32.mrb[27].mxu1  ;;  %v4493_v18 = vpack.c.bf16 %v1073_v43, %v1070_v25  ;;  %v1069_v26 = vld [vmem:[%s5003_s2 + $0x90] sm:$0xff]  ;;  %v1072_v30 = vld [vmem:[%s5003_s2 + $0xa8] sm:$0xff] }
 0x222   :  { %v3571_v58 = vadd.f32 %v4303_v23, %v714_v46  ;;  %v1079_v46 = vld [vmem:[%s5003_s2 + $0xe0] sm:$0xff] }
 0x223   :  { %v2449_v4 = vmul.f32 -1.442695, %v3568_v35  ;;  %v4501_v35 = vpack.c.bf16 %v1072_v30, %v1069_v26 }
 0x224   :  { %v2450_v7 = vmul.f32 -1.442695, %v3571_v58  ;;  %v1075_v58 = vld [vmem:[%s5003_s2 + $0xc0] sm:$0xff] }
 0x225   :  { %3621 = vpow2.f32 %v2449_v4  ;;  %v1078_v4 = vld [vmem:[%s5003_s2 + $0xd8] sm:$0xff] }
 0x226   :  { %3623 = vpow2.f32 %v2450_v7  ;;  %v4519_v7 = vpack.c.bf16 %v1078_v4, %v1075_v58 }
 0x22f   :  { %v3622_v17 = vpop.eup %3621 }
 0x230   :  { %v791_v21 = vadd.f32 1.0, %v3622_v17  ;;  %v3624_v32 = vpop.eup %3623  ;;  %v1082_v17 = vld [vmem:[%s5003_s2 + $0xf8] sm:$0xff] }
 0x231   :  { %v798_v36 = vadd.f32 1.0, %v3624_v32  ;;  %v1081_v32 = vld [vmem:[%s5003_s2 + $0xf0] sm:$0xff] }
 0x232   :  { %3625 = vrcp.f32 %v791_v21  ;;  %v1085_v21 = vld [vmem:[%s5003_s2 + $0x110] sm:$0xff] }
 0x233   :  { %3627 = vrcp.f32 %v798_v36  ;;  %v4532_v36 = vpack.c.bf16 %v1085_v21, %v1082_v17 }
 0x23c   :  { %v3626_v41 = vpop.eup %3625 }
 0x23d   :  { %v801_v53 = vmul.f32 %v3626_v41, %v784_v42  ;;  %v3628_v50 = vpop.eup %3627  ;;  %v1076_v42 = vld [vmem:[%s5003_s2 + $0xc8] sm:$0xff] }
 0x23e   :  { %v804_v51 = vsub.f32 1.0, %v3628_v50  ;;  %v806_v23 = vmul.f32 %v3628_v50, %v4366_v60  ;;  %v4511_v55 = vpack.c.bf16 %v1079_v46, %v1076_v42  ;;  %v1084_v41 = vld [vmem:[%s5003_s2 + $0x108] sm:$0xff] }
 0x23f   :  { %v802_v16 = vadd.f32 %v801_v53, %v4350_v8  ;;  %v1088_v53 = vld [vmem:[%s5003_s2 + $0x128] sm:$0xff]  ;;  %v4543_v50 = vpack.c.bf16 %v1084_v41, %v1081_v32 }
 0x241   :  { %3629 = vtanh.f32 %v802_v16  ;;  %v1091_v16 = vld [vmem:[%s5003_s2 + $0x140] sm:$0xff] }
 0x24b   :  { %v3630_v38 = vpop.eup %3629 }
 0x24c   :  { %v805_v54 = vmul.f32 %v3630_v38, %v804_v51  ;;  %v4545_v51 = vpack.c.bf16 %v1091_v16, %v1088_v53  ;;  %v1087_v38 = vld [vmem:[%s5003_s2 + $0x120] sm:$0xff] }
 0x24e   :  { %v4410_v5 = vadd.f32 %v806_v23, %v805_v54  ;;  %v1090_v54 = vld [vmem:[%s5003_s2 + $0x138] sm:$0xff] }
 0x24f   :  { %v1094_v23 = vld [vmem:[%s5003_s2 + $0x158] sm:$0xff] }
 0x250   :  { %946 = vmatmul.mubr.f32.vlgmr.msra.gmra.mrb[4].mxu0 %v4410_v5  ;;  %2795 = vmatmul.mubr.f32.vlgmr.msra.gmra.mrb[28].mxu1 %v4410_v5 }
 0x251   :  { %3282 = vmatpush3.bf16.msra.mxu1 %v4122_v19  ;;  %1180 = vmatprep.mubr.f32.mxu0 %v5022_v57  ;;  %v1052_v19 = vld [vmem:[%s5003_s2 + $0x8] sm:$0xff] }
 0x252   :  { %3283 = vmatprep.subr.bf16.mxu1 %v5021_v10  ;;  %2829 = vmatprep.mubr.msk.f32.mxu1 %vm3727_vm0, %v5022_v57 }
 0x255   :  { %3285 = vmatpush3.bf16.msra.mxu1 %v4135_v24  ;;  %v1055_v24 = vld [vmem:[%s5003_s2 + $0x20] sm:$0xff] }
 0x256   :  { %3286 = vmatprep.subr.bf16.mxu1 %v5021_v10 }
 0x259   :  { %3288 = vmatpush3.bf16.msra.mxu1 %v4146_v13  ;;  %v4439_v13 = vpack.c.bf16 %v1055_v24, %v1052_v19  ;;  %v1097_v19 = vld [vmem:[%s5003_s2 + $0x170] sm:$0xff]  ;;  %v4561_v24 = vpack.c.bf16 %v1090_v54, %v1087_v38  ;;  %v1291_v38 = vld [vmem:[%s5003_s2 + $0x28] sm:$0xff] }
 0x25a   :  { %3289 = vmatprep.subr.bf16.mxu1 %v5021_v10 }
 0x25b   :  { %3249 = vmatprep.subr.bf16.mxu0 %v4439_v13 }
 0x25d   :  { %3291 = vmatpush3.bf16.msra.mxu1 %v4156_v31  ;;  %v1051_v31 = vld [vmem:[%s5003_s2] sm:$0xff] }
 0x25e   :  { %3292 = vmatprep.subr.bf16.mxu1 %v5021_v10 }
 0x261   :  { %3294 = vmatpush3.bf16.msra.mxu1 %v4166_v37  ;;  %v1054_v37 = vld [vmem:[%s5003_s2 + $0x18] sm:$0xff] }
 0x262   :  { %3295 = vmatprep.subr.bf16.mxu1 %v5021_v10 }
 0x265   :  { %3297 = vmatpush3.bf16.msra.mxu1 %v4178_v40  ;;  %v4447_v40 = vpack.c.bf16 %v1054_v37, %v1051_v31  ;;  %v4564_v31 = vpack.c.bf16 %v1097_v19, %v1094_v23  ;;  %v1093_v37 = vld [vmem:[%s5003_s2 + $0x150] sm:$0xff]  ;;  %v1294_v23 = vld [vmem:[%s5003_s2 + $0x40] sm:$0xff]  ;;  %v1297_v19 = vld [vmem:[%s5003_s2 + $0x58] sm:$0xff] }
 0x266   :  { %3298 = vmatprep.subr.bf16.mxu1 %v5021_v10 }
 0x267   :  { %3251 = vmatpush1.bf16.msra.mxu0 %v4447_v40 }
 0x269   :  { %3300 = vmatpush3.bf16.msra.mxu1 %v4188_v45  ;;  %v1058_v45 = vld [vmem:[%s5003_s2 + $0x38] sm:$0xff] }
 0x26a   :  { %3301 = vmatprep.subr.bf16.mxu1 %v5021_v10 }
 0x26d   :  { %3303 = vmatpush3.bf16.msra.mxu1 %v4198_v49  ;;  %v1061_v49 = vld [vmem:[%s5003_s2 + $0x50] sm:$0xff] }
 0x26e   :  { %3336 = vmatprep.subr.bf16.mxu1 %v5021_v10  ;;  %v4457_v8 = vpack.c.bf16 %v1061_v49, %v1058_v45  ;;  %v1096_v45 = vld [vmem:[%s5003_s2 + $0x168] sm:$0xff] }
 0x26f   :  { %v4573_v49 = vpack.c.bf16 %v1096_v45, %v1093_v37  ;;  %v4623_v37 = vpack.c.bf16 %v1297_v19, %v1294_v23  ;;  %v1300_v45 = vld [vmem:[%s5003_s2 + $0x70] sm:$0xff] }
 0x270   :  { %3253 = vmatprep.subr.bf16.mxu0 %v4457_v8 }
 0x271   :  { %3255 = vmatpush1.bf16.msra.mxu0 %v4465_v1 }
 0x272   :  { %3257 = vmatprep.subr.bf16.mxu0 %v4475_v62 }
 0x275   :  { %3259 = vmatpush1.bf16.msra.mxu0 %v4483_v0 }
 0x276   :  { %3261 = vmatprep.subr.bf16.mxu0 %v4493_v18 }
 0x279   :  { %3263 = vmatpush1.bf16.msra.mxu0 %v4501_v35 }
 0x27a   :  { %3265 = vmatprep.subr.bf16.mxu0 %v4511_v55 }
 0x27d   :  { %3267 = vmatpush1.bf16.msra.mxu0 %v4519_v7 }
 0x27e   :  { %3269 = vmatprep.subr.bf16.mxu0 %v4532_v36 }
 0x281   :  { %3271 = vmatpush1.bf16.msra.mxu0 %v4543_v50 }
 0x282   :  { %3273 = vmatprep.subr.bf16.mxu0 %v4545_v51 }
 0x285   :  { %3275 = vmatpush1.bf16.msra.mxu0 %v4561_v24 }
 0x286   :  { %3277 = vmatprep.subr.bf16.mxu0 %v4564_v31 }
 0x289   :  { %3279 = vmatpush1.bf16.msra.mxu0 %v4573_v49 }
 0x28a   :  { %3305 = vmatprep.subr.bf16.mxu0 %v4439_v13 }
 0x323   :  { %v947_v44 = vpop.f32.mrb[4].mxu0  ;;  %v1018_v11 = vpop.f32.mrb[28].mxu1 }
 0x324   :  { %v3574_v9 = vadd.f32 %v4305_v6, %v947_v44  ;;  %v1019_v52 = vadd.f32 %v1018_v11, %v877_v29  ;;  %v949_v48 = vpop.f32.mrb[5].mxu0  ;;  %v2796_v25 = vpop.f32.mrb[29].mxu1  ;;  %v1303_v29 = vld [vmem:[%s5003_s2 + $0x88] sm:$0xff]  ;;  %v1306_v11 = vld [vmem:[%s5003_s2 + $0xa0] sm:$0xff] }
 0x325   :  { %v3577_v43 = vadd.f32 %v4309_v27, %v949_v48  ;;  %v4633_v44 = vpack.c.bf16 %v1303_v29, %v1300_v45  ;;  %v1312_v48 = vld [vmem:[%s5003_s2 + $0xd0] sm:$0xff]  ;;  %v1315_v25 = vld [vmem:[%s5003_s2 + $0xe8] sm:$0xff] }
 0x326   :  { %v2451_v26 = vmul.f32 -1.442695, %v3574_v9  ;;  %v1309_v9 = vld [vmem:[%s5003_s2 + $0xb8] sm:$0xff] }
 0x327   :  { %v2452_v30 = vmul.f32 -1.442695, %v3577_v43  ;;  %v4653_v43 = vpack.c.bf16 %v1315_v25, %v1312_v48 }
 0x328   :  { %3631 = vpow2.f32 %v2451_v26  ;;  %v1318_v26 = vld [vmem:[%s5003_s2 + $0x100] sm:$0xff] }
 0x329   :  { %3633 = vpow2.f32 %v2452_v30  ;;  %v1321_v30 = vld [vmem:[%s5003_s2 + $0x118] sm:$0xff] }
 0x332   :  { %v3632_v42 = vpop.eup %3631 }
 0x333   :  { %v1026_v46 = vadd.f32 1.0, %v3632_v42  ;;  %v3634_v58 = vpop.eup %3633  ;;  %v4663_v42 = vpack.c.bf16 %v1321_v30, %v1318_v26 }
 0x334   :  { %v1033_v4 = vadd.f32 1.0, %v3634_v58  ;;  %v1327_v58 = vld [vmem:[%s5003_s2 + $0x148] sm:$0xff] }
 0x335   :  { %3635 = vrcp.f32 %v1026_v46  ;;  %v1324_v46 = vld [vmem:[%s5003_s2 + $0x130] sm:$0xff] }
 0x336   :  { %3637 = vrcp.f32 %v1033_v4  ;;  %v4672_v4 = vpack.c.bf16 %v1327_v58, %v1324_v46 }
 0x33f   :  { %v3636_v17 = vpop.eup %3635 }
 0x340   :  { %v1036_v56 = vmul.f32 %v3636_v17, %v1019_v52  ;;  %v3638_v6 = vpop.eup %3637  ;;  %v4643_v52 = vpack.c.bf16 %v1309_v9, %v1306_v11  ;;  %v1330_v17 = vld [vmem:[%s5003_s2 + $0x160] sm:$0xff] }
 0x341   :  { %v1039_v32 = vsub.f32 1.0, %v3638_v6  ;;  %v1041_v27 = vmul.f32 %v3638_v6, %v4410_v5  ;;  %v1112_v6 = vrot.slane %v4244_v59, %v4330_v39 }
 0x342   :  { %v1037_v21 = vadd.f32 %v1036_v56, %v4354_v47  ;;  %v1288_v47 = vld [vmem:[%s5003_s2 + $0x10] sm:$0xff]  ;;  %v1333_v56 = vld [vmem:[%s5003_s2 + $0x178] sm:$0xff] }
 0x343   :  { %v4613_v54 = vpack.c.bf16 %v1291_v38, %v1288_v47 }
 0x344   :  { %3639 = vtanh.f32 %v1037_v21  ;;  %v4682_v21 = vpack.c.bf16 %v1333_v56, %v1330_v17 }
 0x34e   :  { %v3640_v41 = vpop.eup %3639 }
 0x34f   :  { %v1040_v53 = vmul.f32 %v3640_v41, %v1039_v32 }
 0x351   :  { %v4584_v16 = vadd.f32 %v1041_v27, %v1040_v53 }
 0x353   :  { %1181 = vmatmul.mubr.f32.vlgmr.msra.gmra.mrb[6].mxu0 %v4584_v16  ;;  %2830 = vmatmul.mubr.f32.vlgmr.msra.gmra.mrb[30].mxu1 %v4584_v16 }
 0x354   :  { %3307 = vmatpush1.bf16.msra.mxu0 %v4447_v40  ;;  %1415 = vmatprep.mubr.f32.mxu0 %v5022_v57 }
 0x355   :  { %3309 = vmatprep.subr.bf16.mxu0 %v4457_v8  ;;  %2864 = vmatprep.mubr.msk.f32.mxu1 %vm3727_vm0, %v5022_v57 }
 0x356   :  { %3338 = vmatpush3.bf16.msra.mxu1 %v4613_v54 }
 0x357   :  { %3339 = vmatprep.subr.bf16.mxu1 %v5021_v10 }
 0x358   :  { %3311 = vmatpush1.bf16.msra.mxu0 %v4465_v1 }
 0x359   :  { %3313 = vmatprep.subr.bf16.mxu0 %v4475_v62 }
 0x35a   :  { %3341 = vmatpush3.bf16.msra.mxu1 %v4623_v37 }
 0x35b   :  { %3342 = vmatprep.subr.bf16.mxu1 %v5021_v10 }
 0x35c   :  { %3315 = vmatpush1.bf16.msra.mxu0 %v4483_v0 }
 0x35d   :  { %3317 = vmatprep.subr.bf16.mxu0 %v4493_v18 }
 0x35e   :  { %3344 = vmatpush3.bf16.msra.mxu1 %v4633_v44 }
 0x35f   :  { %3345 = vmatprep.subr.bf16.mxu1 %v5021_v10 }
 0x360   :  { %3319 = vmatpush1.bf16.msra.mxu0 %v4501_v35 }
 0x361   :  { %3321 = vmatprep.subr.bf16.mxu0 %v4511_v55 }
 0x362   :  { %3347 = vmatpush3.bf16.msra.mxu1 %v4643_v52 }
 0x363   :  { %3348 = vmatprep.subr.bf16.mxu1 %v5021_v10 }
 0x364   :  { %3323 = vmatpush1.bf16.msra.mxu0 %v4519_v7 }
 0x365   :  { %3325 = vmatprep.subr.bf16.mxu0 %v4532_v36 }
 0x366   :  { %3350 = vmatpush3.bf16.msra.mxu1 %v4653_v43 }
 0x367   :  { %3351 = vmatprep.subr.bf16.mxu1 %v5021_v10 }
 0x368   :  { %3327 = vmatpush1.bf16.msra.mxu0 %v4543_v50 }
 0x369   :  { %3329 = vmatprep.subr.bf16.mxu0 %v4545_v51 }
 0x36a   :  { %3353 = vmatpush3.bf16.msra.mxu1 %v4663_v42 }
 0x36b   :  { %3354 = vmatprep.subr.bf16.mxu1 %v5021_v10 }
 0x36c   :  { %3331 = vmatpush1.bf16.msra.mxu0 %v4561_v24 }
 0x36d   :  { %3333 = vmatprep.subr.bf16.mxu0 %v4564_v31 }
 0x36e   :  { %3356 = vmatpush3.bf16.msra.mxu1 %v4672_v4 }
 0x36f   :  { %3357 = vmatprep.subr.bf16.mxu1 %v5021_v10 }
 0x370   :  { %3335 = vmatpush1.bf16.msra.mxu0 %v4573_v49 }
 0x371   :  { %3361 = vmatprep.subr.bf16.mxu0 %v4439_v13 }
 0x372   :  { %3359 = vmatpush3.bf16.msra.mxu1 %v4682_v21 }
 0x373   :  { %3392 = vmatprep.subr.bf16.mxu1 %v5021_v10 }
 0x426   :  { %v1182_v32 = vpop.f32.mrb[6].mxu0  ;;  %v1253_v41 = vpop.f32.mrb[30].mxu1 }
 0x427   :  { %v3580_v53 = vadd.f32 %v4311_v34, %v1182_v32  ;;  %v1254_v27 = vadd.f32 %v1253_v41, %v1112_v6  ;;  %v1184_v47 = vpop.f32.mrb[7].mxu0  ;;  %v2831_v38 = vpop.f32.mrb[31].mxu1 }
 0x428   :  { %v3583_v23 = vadd.f32 %v4315_v3, %v1184_v47 }
 0x429   :  { %v2453_v19 = vmul.f32 -1.442695, %v3580_v53 }
 0x42a   :  { %v2454_v45 = vmul.f32 -1.442695, %v3583_v23 }
 0x42b   :  { %3641 = vpow2.f32 %v2453_v19 }
 0x42c   :  { %3643 = vpow2.f32 %v2454_v45 }
 0x435   :  { %v3642_v29 = vpop.eup %3641 }
 0x436   :  { %v1261_v11 = vadd.f32 1.0, %v3642_v29  ;;  %v3644_v9 = vpop.eup %3643 }
 0x437   :  { %v1268_v48 = vadd.f32 1.0, %v3644_v9 }
 0x438   :  { %3645 = vrcp.f32 %v1261_v11 }
 0x439   :  { %3647 = vrcp.f32 %v1268_v48 }
 0x442   :  { %v3646_v25 = vpop.eup %3645 }
 0x443   :  { %v1271_v59 = vmul.f32 %v3646_v25, %v1254_v27  ;;  %v3648_v34 = vpop.eup %3647 }
 0x444   :  { %v1274_v30 = vsub.f32 1.0, %v3648_v34  ;;  %v1276_v3 = vmul.f32 %v3648_v34, %v4584_v16 }
 0x445   :  { %v1272_v26 = vadd.f32 %v1271_v59, %v4352_v20  ;;  %v1347_v20 = vrot.slane %v4251_v61, %v4330_v39 }
 0x447   :  { %3649 = vtanh.f32 %v1272_v26 }
 0x451   :  { %v3650_v46 = vpop.eup %3649 }
 0x452   :  { %v1275_v58 = vmul.f32 %v3650_v46, %v1274_v30 }
 0x454   :  { %v4693_v17 = vadd.f32 %v1276_v3, %v1275_v58 }
 0x456   :  { %1416 = vmatmul.mubr.f32.vlgmr.msra.gmra.mrb[8].mxu0 %v4693_v17  ;;  %2865 = vmatmul.mubr.f32.vlgmr.msra.gmra.mrb[32].mxu1 %v4693_v17 }
 0x457   :  { %3363 = vmatpush1.bf16.msra.mxu0 %v4447_v40  ;;  %3394 = vmatpush3.bf16.msra.mxu1 %v4613_v54 }
 0x458   :  { %3365 = vmatprep.subr.bf16.mxu0 %v4457_v8  ;;  %3395 = vmatprep.subr.bf16.mxu1 %v5021_v10 }
 0x459   :  { %1650 = vmatprep.mubr.f32.mxu0 %v5022_v57  ;;  %2899 = vmatprep.mubr.msk.f32.mxu1 %vm3727_vm0, %v5022_v57 }
 0x45b   :  { %3367 = vmatpush1.bf16.msra.mxu0 %v4465_v1  ;;  %3397 = vmatpush3.bf16.msra.mxu1 %v4623_v37 }
 0x45c   :  { %3369 = vmatprep.subr.bf16.mxu0 %v4475_v62  ;;  %3398 = vmatprep.subr.bf16.mxu1 %v5021_v10 }
 0x45f   :  { %3371 = vmatpush1.bf16.msra.mxu0 %v4483_v0  ;;  %3400 = vmatpush3.bf16.msra.mxu1 %v4633_v44 }
 0x460   :  { %3373 = vmatprep.subr.bf16.mxu0 %v4493_v18  ;;  %3401 = vmatprep.subr.bf16.mxu1 %v5021_v10 }
 0x463   :  { %3375 = vmatpush1.bf16.msra.mxu0 %v4501_v35  ;;  %3403 = vmatpush3.bf16.msra.mxu1 %v4643_v52 }
 0x464   :  { %3377 = vmatprep.subr.bf16.mxu0 %v4511_v55  ;;  %3404 = vmatprep.subr.bf16.mxu1 %v5021_v10 }
 0x467   :  { %3379 = vmatpush1.bf16.msra.mxu0 %v4519_v7  ;;  %3406 = vmatpush3.bf16.msra.mxu1 %v4653_v43 }
 0x468   :  { %3381 = vmatprep.subr.bf16.mxu0 %v4532_v36  ;;  %3407 = vmatprep.subr.bf16.mxu1 %v5021_v10 }
 0x46b   :  { %3383 = vmatpush1.bf16.msra.mxu0 %v4543_v50  ;;  %3409 = vmatpush3.bf16.msra.mxu1 %v4663_v42 }
 0x46c   :  { %3385 = vmatprep.subr.bf16.mxu0 %v4545_v51  ;;  %3410 = vmatprep.subr.bf16.mxu1 %v5021_v10 }
 0x46f   :  { %3387 = vmatpush1.bf16.msra.mxu0 %v4561_v24  ;;  %3412 = vmatpush3.bf16.msra.mxu1 %v4672_v4 }
 0x470   :  { %3389 = vmatprep.subr.bf16.mxu0 %v4564_v31  ;;  %3413 = vmatprep.subr.bf16.mxu1 %v5021_v10 }
 0x473   :  { %3391 = vmatpush1.bf16.msra.mxu0 %v4573_v49  ;;  %3415 = vmatpush3.bf16.msra.mxu1 %v4682_v21 }
 0x474   :  { %3417 = vmatprep.subr.bf16.mxu0 %v4439_v13  ;;  %3448 = vmatprep.subr.bf16.mxu1 %v5021_v10 }
 0x529   :  { %v1417_v56 = vpop.f32.mrb[8].mxu0  ;;  %v1488_v6 = vpop.f32.mrb[32].mxu1 }
 0x52a   :  { %v3586_v32 = vadd.f32 %v4317_v15, %v1417_v56  ;;  %v1489_v41 = vadd.f32 %v1488_v6, %v1347_v20  ;;  %v1419_v53 = vpop.f32.mrb[9].mxu0  ;;  %v2866_v27 = vpop.f32.mrb[33].mxu1  ;;  %v2004_v20 = vld [vmem:[%s5003_s2 + $0x68] sm:$0xff]  ;;  %v2007_v56 = vld [vmem:[%s5003_s2 + $0x80] sm:$0xff] }
 0x52b   :  { %v3589_v47 = vadd.f32 %v4321_v14, %v1419_v53  ;;  %v3480_v6 = vpack.c.bf16 %v2007_v56, %v2004_v20  ;;  %v2010_v27 = vld [vmem:[%s5003_s2 + $0x98] sm:$0xff]  ;;  %v5024_v56 = vld [vmem:[#allocation8_spill] sm:$0xff] }
 0x52c   :  { %v2455_v38 = vmul.f32 -1.442695, %v3586_v32  ;;  %v2003_v32 = vld [vmem:[%s5003_s2 + $0x60] sm:$0xff] }
 0x52d   :  { %v2456_v23 = vmul.f32 -1.442695, %v3589_v47  ;;  %v2013_v47 = vld [vmem:[%s5003_s2 + $0xb0] sm:$0xff] }
 0x52e   :  { %3651 = vpow2.f32 %v2455_v38  ;;  %v3484_v38 = vpack.c.bf16 %v2013_v47, %v2010_v27  ;;  %v2231_v27 = vld [vmem:[%s5007_s5 + $0x18] sm:$0xff] }
 0x52f   :  { %3653 = vpow2.f32 %v2456_v23  ;;  %v2009_v23 = vld [vmem:[%s5003_s2 + $0x90] sm:$0xff] }
 0x538   :  { %v3652_v19 = vpop.eup %3651 }
 0x539   :  { %v1496_v13 = vadd.f32 1.0, %v3652_v19  ;;  %v3654_v45 = vpop.eup %3653  ;;  %v2012_v19 = vld [vmem:[%s5003_s2 + $0xa8] sm:$0xff] }
 0x53a   :  { %v1503_v29 = vadd.f32 1.0, %v3654_v45  ;;  %v2016_v45 = vld [vmem:[%s5003_s2 + $0xc8] sm:$0xff] }
 0x53b   :  { %3655 = vrcp.f32 %v1496_v13  ;;  %v3486_v13 = vpack.c.bf16 %v2012_v19, %v2009_v23 }
 0x53c   :  { %3657 = vrcp.f32 %v1503_v29  ;;  %v2019_v29 = vld [vmem:[%s5003_s2 + $0xe0] sm:$0xff] }
 0x545   :  { %v3656_v11 = vpop.eup %3655 }
 0x546   :  { %v1506_v61 = vmul.f32 %v3656_v11, %v1489_v41  ;;  %v3658_v15 = vpop.eup %3657  ;;  %v2006_v41 = vld [vmem:[%s5003_s2 + $0x78] sm:$0xff]  ;;  %v3488_v11 = vpack.c.bf16 %v2019_v29, %v2016_v45  ;;  %v2233_v45 = vld [vmem:[%s5007_s5 + $0x28] sm:$0xff] }
 0x547   :  { %v1509_v48 = vsub.f32 1.0, %v3658_v15  ;;  %v1511_v14 = vmul.f32 %v3658_v15, %v4693_v17  ;;  %v3482_v53 = vpack.c.bf16 %v2006_v41, %v2003_v32 }
 0x548   :  { %v1507_v9 = vadd.f32 %v1506_v61, %v4358_v22  ;;  %v1582_v22 = vrot.slane %v4258_v63, %v4330_v39  ;;  %v2015_v61 = vld [vmem:[%s5003_s2 + $0xc0] sm:$0xff] }
 0x54a   :  { %3659 = vtanh.f32 %v1507_v9  ;;  %v2018_v9 = vld [vmem:[%s5003_s2 + $0xd8] sm:$0xff] }
 0x54b   :  { %v3490_v15 = vpack.c.bf16 %v2018_v9, %v2015_v61  ;;  %v2235_v61 = vld [vmem:[%s5007_s5 + $0x38] sm:$0xff] }
 0x554   :  { %v3660_v25 = vpop.eup %3659 }
 0x555   :  { %v1510_v59 = vmul.f32 %v3660_v25, %v1509_v48  ;;  %v2022_v48 = vld [vmem:[%s5003_s2 + $0xf8] sm:$0xff]  ;;  %v2025_v25 = vld [vmem:[%s5003_s2 + $0x110] sm:$0xff] }
 0x557   :  { %v4738_v26 = vadd.f32 %v1511_v14, %v1510_v59  ;;  %v3492_v59 = vpack.c.bf16 %v2025_v25, %v2022_v48  ;;  %v2021_v14 = vld [vmem:[%s5003_s2 + $0xf0] sm:$0xff] }
 0x558   :  { %v2238_v25 = vld [vmem:[%s5007_s5 + $0x50] sm:$0xff] }
 0x559   :  { %1651 = vmatmul.mubr.f32.vlgmr.msra.gmra.mrb[10].mxu0 %v4738_v26  ;;  %2900 = vmatmul.mubr.f32.vlgmr.msra.gmra.mrb[34].mxu1 %v4738_v26 }
 0x55a   :  { %3419 = vmatpush1.bf16.msra.mxu0 %v4447_v40  ;;  %3450 = vmatpush3.bf16.msra.mxu1 %v4613_v54 }
 0x55b   :  { %3421 = vmatprep.subr.bf16.mxu0 %v4457_v8  ;;  %3451 = vmatprep.subr.bf16.mxu1 %v5021_v10 }
 0x55c   :  { %1885 = vmatprep.mubr.f32.mxu0 %v5022_v57  ;;  %2934 = vmatprep.mubr.msk.f32.mxu1 %vm3727_vm0, %v5022_v57 }
 0x55e   :  { %3423 = vmatpush1.bf16.msra.mxu0 %v4465_v1  ;;  %3453 = vmatpush3.bf16.msra.mxu1 %v4623_v37 }
 0x55f   :  { %3425 = vmatprep.subr.bf16.mxu0 %v4475_v62  ;;  %3454 = vmatprep.subr.bf16.mxu1 %v5021_v10 }
 0x562   :  { %3427 = vmatpush1.bf16.msra.mxu0 %v4483_v0  ;;  %3456 = vmatpush3.bf16.msra.mxu1 %v4633_v44 }
 0x563   :  { %3429 = vmatprep.subr.bf16.mxu0 %v4493_v18  ;;  %3457 = vmatprep.subr.bf16.mxu1 %v5021_v10 }
 0x566   :  { %3431 = vmatpush1.bf16.msra.mxu0 %v4501_v35  ;;  %3459 = vmatpush3.bf16.msra.mxu1 %v4643_v52 }
 0x567   :  { %3433 = vmatprep.subr.bf16.mxu0 %v4511_v55  ;;  %3460 = vmatprep.subr.bf16.mxu1 %v5021_v10 }
 0x56a   :  { %3435 = vmatpush1.bf16.msra.mxu0 %v4519_v7  ;;  %3462 = vmatpush3.bf16.msra.mxu1 %v4653_v43 }
 0x56b   :  { %3437 = vmatprep.subr.bf16.mxu0 %v4532_v36  ;;  %3463 = vmatprep.subr.bf16.mxu1 %v5021_v10 }
 0x56e   :  { %3439 = vmatpush1.bf16.msra.mxu0 %v4543_v50  ;;  %3465 = vmatpush3.bf16.msra.mxu1 %v4663_v42 }
 0x56f   :  { %3441 = vmatprep.subr.bf16.mxu0 %v4545_v51  ;;  %3466 = vmatprep.subr.bf16.mxu1 %v5021_v10 }
 0x572   :  { %3443 = vmatpush1.bf16.msra.mxu0 %v4561_v24  ;;  %3468 = vmatpush3.bf16.msra.mxu1 %v4672_v4 }
 0x573   :  { %3445 = vmatprep.subr.bf16.mxu0 %v4564_v31  ;;  %3469 = vmatprep.subr.bf16.mxu1 %v5021_v10 }
 0x576   :  { %3447 = vmatpush1.bf16.msra.mxu0 %v4573_v49  ;;  %3471 = vmatpush3.bf16.msra.mxu1 %v4682_v21 }
 0x577   :  { %3504 = vmatprep.subr.bf16.mxu1 %v5021_v10 }
 0x62c   :  { %v1652_v40 = vpop.f32.mrb[10].mxu0  ;;  %v1723_v8 = vpop.f32.mrb[34].mxu1 }
 0x62d   :  { %v3592_v1 = vadd.f32 %v4323_v28, %v1652_v40  ;;  %v1724_v62 = vadd.f32 %v1723_v8, %v1582_v22  ;;  %v1654_v0 = vpop.f32.mrb[11].mxu0  ;;  %v2901_v18 = vpop.f32.mrb[35].mxu1  ;;  %v2024_v22 = vld [vmem:[%s5003_s2 + $0x108] sm:$0xff] }
 0x62e   :  { %v3595_v35 = vadd.f32 %v4327_v33, %v1654_v0  ;;  %v2028_v40 = vld [vmem:[%s5003_s2 + $0x128] sm:$0xff]  ;;  %v3494_v8 = vpack.c.bf16 %v2024_v22, %v2021_v14  ;;  %v2030_v0 = vld [vmem:[%s5003_s2 + $0x138] sm:$0xff]  ;;  %v2240_v22 = vld [vmem:[%s5007_s5 + $0x60] sm:$0xff] }
 0x62f   :  { %v2457_v55 = vmul.f32 -1.442695, %v3592_v1  ;;  %v2031_v1 = vld [vmem:[%s5003_s2 + $0x140] sm:$0xff] }
 0x630   :  { %v2458_v7 = vmul.f32 -1.442695, %v3595_v35  ;;  %v3496_v18 = vpack.c.bf16 %v2031_v1, %v2028_v40  ;;  %v2034_v35 = vld [vmem:[%s5003_s2 + $0x158] sm:$0xff]  ;;  %v2241_v40 = vld [vmem:[%s5007_s5 + $0x68] sm:$0xff]  ;;  %v2242_v1 = vld [vmem:[%s5007_s5 + $0x70] sm:$0xff] }
 0x631   :  { %3661 = vpow2.f32 %v2457_v55  ;;  %v2037_v55 = vld [vmem:[%s5003_s2 + $0x170] sm:$0xff] }
 0x632   :  { %3663 = vpow2.f32 %v2458_v7 }
 0x63b   :  { %v3662_v36 = vpop.eup %3661 }
 0x63c   :  { %v1731_v50 = vadd.f32 1.0, %v3662_v36  ;;  %v3664_v51 = vpop.eup %3663  ;;  %v3500_v36 = vpack.c.bf16 %v2037_v55, %v2034_v35 }
 0x63d   :  { %v1738_v24 = vadd.f32 1.0, %v3664_v51  ;;  %v2036_v51 = vld [vmem:[%s5003_s2 + $0x168] sm:$0xff] }
 0x63e   :  { %3665 = vrcp.f32 %v1731_v50  ;;  %v2033_v50 = vld [vmem:[%s5003_s2 + $0x150] sm:$0xff] }
 0x63f   :  { %3667 = vrcp.f32 %v1738_v24  ;;  %v2228_v24 = vld [vmem:[%s5007_s5] sm:$0xff] }
 0x648   :  { %v3666_v31 = vpop.eup %3665 }
 0x649   :  { %v1741_v63 = vmul.f32 %v3666_v31, %v1724_v62  ;;  %v3668_v28 = vpop.eup %3667  ;;  %v2027_v62 = vld [vmem:[%s5003_s2 + $0x120] sm:$0xff]  ;;  %v2229_v31 = vld [vmem:[%s5007_s5 + $0x8] sm:$0xff] }
 0x64a   :  { %v1744_v34 = vsub.f32 1.0, %v3668_v28  ;;  %v1746_v33 = vmul.f32 %v3668_v28, %v4738_v26  ;;  %v3498_v7 = vpack.c.bf16 %v2030_v0, %v2027_v62  ;;  %v3723_v28 = vld [vmem:[%s5005_s4] sm:$0x7]  ;;  %v2243_v62 = vld [vmem:[%s5007_s5 + $0x78] sm:$0xff] }
 0x64b   :  { %v1742_v49 = vadd.f32 %v1741_v63, %v4356_v12  ;;  %v1992_v12 = vld [vmem:[%s5003_s2 + $0x8] sm:$0xff]  ;;  %v3502_v63 = vpack.c.bf16 %v2036_v51, %v2033_v50  ;;  %v3556_v0 = vpack.c.bf16 %v2243_v62, %v2242_v1 }
 0x64d   :  { %3669 = vtanh.f32 %v1742_v49  ;;  %v3528_v49 = vpack.c.bf16 %v2229_v31, %v2228_v24 }
 0x657   :  { %v3670_v30 = vpop.eup %3669 }
 0x658   :  { %v1745_v46 = vmul.f32 %v3670_v30, %v1744_v34  ;;  %v1817_v34 = vrot.slane %v3723_v28, %v4330_v39 }
 0x65a   :  { %v4782_v58 = vadd.f32 %v1746_v33, %v1745_v46 }
 0x65c   :  { %1886 = vmatmul.mubr.f32.vlgmr.msra.gmra.mrb[12].mxu0 %v4782_v58  ;;  %2935 = vmatmul.mubr.f32.vlgmr.msra.gmra.mrb[36].mxu1 %v4782_v58 }
 0x65d   :  { %3506 = vmatpush3.bf16.msra.mxu1 %v4613_v54  ;;  %2120 = vmatprep.mubr.f32.mxu0 %v5022_v57 }
 0x65e   :  { %3507 = vmatprep.subr.bf16.mxu1 %v5021_v10  ;;  %2969 = vmatprep.mubr.msk.f32.mxu1 %vm3727_vm0, %v5022_v57  ;;  %v1995_v57 = vld [vmem:[%s5003_s2 + $0x20] sm:$0xff] }
 0x65f   :  { %v3472_v54 = vpack.c.bf16 %v1995_v57, %v1992_v12 }
 0x661   :  { %3509 = vmatpush3.bf16.msra.mxu1 %v4623_v37  ;;  %v1991_v37 = vld [vmem:[%s5003_s2] sm:$0xff]  ;;  %3473 = vmatprep.subr.bf16.mxu0 %v3472_v54 }
 0x662   :  { %3510 = vmatprep.subr.bf16.mxu1 %v5021_v10 }
 0x665   :  { %3512 = vmatpush3.bf16.msra.mxu1 %v4633_v44  ;;  %v1994_v44 = vld [vmem:[%s5003_s2 + $0x18] sm:$0xff] }
 0x666   :  { %3513 = vmatprep.subr.bf16.mxu1 %v5021_v10 }
 0x669   :  { %3515 = vmatpush3.bf16.msra.mxu1 %v4643_v52  ;;  %v1998_v52 = vld [vmem:[%s5003_s2 + $0x38] sm:$0xff] }
 0x66a   :  { %3516 = vmatprep.subr.bf16.mxu1 %v5021_v10 }
 0x66d   :  { %3518 = vmatpush3.bf16.msra.mxu1 %v4653_v43  ;;  %v2001_v43 = vld [vmem:[%s5003_s2 + $0x50] sm:$0xff] }
 0x66e   :  { %3519 = vmatprep.subr.bf16.mxu1 %v5021_v10 }
 0x671   :  { %3521 = vmatpush3.bf16.msra.mxu1 %v4663_v42  ;;  %v3476_v42 = vpack.c.bf16 %v2001_v43, %v1998_v52 }
 0x672   :  { %3522 = vmatprep.subr.bf16.mxu1 %v5021_v10 }
 0x675   :  { %3524 = vmatpush3.bf16.msra.mxu1 %v4672_v4  ;;  %v1997_v4 = vld [vmem:[%s5003_s2 + $0x30] sm:$0xff] }
 0x676   :  { %3525 = vmatprep.subr.bf16.mxu1 %v5021_v10  ;;  %v3474_v10 = vpack.c.bf16 %v1994_v44, %v1991_v37  ;;  %v5023_v37 = vld [vmem:[#allocation4_spill] sm:$0xff] }
 0x678   :  { %3475 = vmatpush1.bf16.msra.mxu0 %v3474_v10 }
 0x679   :  { %3527 = vmatpush3.bf16.msra.mxu1 %v4682_v21  ;;  %v2000_v21 = vld [vmem:[%s5003_s2 + $0x48] sm:$0xff]  ;;  %3477 = vmatprep.subr.bf16.mxu0 %v3476_v42 }
 0x67a   :  { %v3478_v3 = vpack.c.bf16 %v2000_v21, %v1997_v4 }
 0x67c   :  { %3479 = vmatpush1.bf16.msra.mxu0 %v3478_v3 }
 0x67d   :  { %3481 = vmatprep.subr.bf16.mxu0 %v3480_v6 }
 0x680   :  { %3483 = vmatpush1.bf16.msra.mxu0 %v3482_v53  ;;  %v2230_v53 = vld [vmem:[%s5007_s5 + $0x10] sm:$0xff] }
 0x681   :  { %3485 = vmatprep.subr.bf16.mxu0 %v3484_v38  ;;  %v3532_v19 = vpack.c.bf16 %v2231_v27, %v2230_v53 }
 0x684   :  { %3487 = vmatpush1.bf16.msra.mxu0 %v3486_v13  ;;  %v2232_v13 = vld [vmem:[%s5007_s5 + $0x20] sm:$0xff] }
 0x685   :  { %3489 = vmatprep.subr.bf16.mxu0 %v3488_v11  ;;  %v3536_v29 = vpack.c.bf16 %v2233_v45, %v2232_v13  ;;  %v2234_v11 = vld [vmem:[%s5007_s5 + $0x30] sm:$0xff] }
 0x686   :  { %v3540_v9 = vpack.c.bf16 %v2235_v61, %v2234_v11 }
 0x688   :  { %3491 = vmatpush1.bf16.msra.mxu0 %v3490_v15  ;;  %v2236_v15 = vld [vmem:[%s5007_s5 + $0x40] sm:$0xff] }
 0x689   :  { %3493 = vmatprep.subr.bf16.mxu0 %v3492_v59  ;;  %v2239_v59 = vld [vmem:[%s5007_s5 + $0x58] sm:$0xff] }
 0x68a   :  { %v3548_v14 = vpack.c.bf16 %v2239_v59, %v2238_v25 }
 0x68c   :  { %3495 = vmatpush1.bf16.msra.mxu0 %v3494_v8  ;;  %v3552_v8 = vpack.c.bf16 %v2241_v40, %v2240_v22 }
 0x68d   :  { %3497 = vmatprep.subr.bf16.mxu0 %v3496_v18  ;;  %v3724_v18 = vld [vmem:[%s5005_s4] sm:$0x7] }
 0x68e   :  { %v2052_v35 = vrot.slane %v3724_v18, %v4330_v39 }
 0x690   :  { %3499 = vmatpush1.bf16.msra.mxu0 %v3498_v7 }
 0x691   :  { %3501 = vmatprep.subr.bf16.mxu0 %v3500_v36  ;;  %v5025_v36 = vld [vmem:[#allocation5_spill] sm:$0xff] }
 0x694   :  { %3503 = vmatpush1.bf16.msra.mxu0 %v3502_v63 }
 0x695   :  { %3529 = vmatprep.subr.bf16.mxu0 %v3528_v49 }
 0x72f   :  { %v1887_v30 = vpop.f32.mrb[12].mxu0  ;;  %v1958_v46 = vpop.f32.mrb[36].mxu1 }
 0x730   :  { %v3598_v33 = vadd.f32 %v4332_v2, %v1887_v30  ;;  %v1959_v12 = vadd.f32 %v1958_v46, %v1817_v34  ;;  %v1889_v57 = vpop.f32.mrb[13].mxu0  ;;  %v2936_v54 = vpop.f32.mrb[37].mxu1  ;;  %v2463_v30 = vld [vmem:[%s5008_s6] ss:$0 sm:$0xff]  ;;  %v5027_v46 = vld [vmem:[#allocation7_spill] sm:$0xff] }
 0x731   :  { %v3601_v44 = vadd.f32 %v5023_v37, %v1889_v57 }
 0x732   :  { %v2459_v10 = vmul.f32 -1.442695, %v3598_v33 }
 0x733   :  { %v2460_v52 = vmul.f32 -1.442695, %v3601_v44 }
 0x734   :  { %3671 = vpow2.f32 %v2459_v10 }
 0x735   :  { %3673 = vpow2.f32 %v2460_v52 }
 0x73e   :  { %v3672_v43 = vpop.eup %3671 }
 0x73f   :  { %v1966_v42 = vadd.f32 1.0, %v3672_v43  ;;  %v3674_v4 = vpop.eup %3673 }
 0x740   :  { %v1973_v21 = vadd.f32 1.0, %v3674_v4 }
 0x741   :  { %3675 = vrcp.f32 %v1966_v42 }
 0x742   :  { %3677 = vrcp.f32 %v1973_v21 }
 0x74b   :  { %v3676_v3 = vpop.eup %3675 }
 0x74c   :  { %v1976_v20 = vmul.f32 %v3676_v3, %v1959_v12  ;;  %v3678_v2 = vpop.eup %3677 }
 0x74d   :  { %v1979_v32 = vsub.f32 1.0, %v3678_v2  ;;  %v1981_v38 = vmul.f32 %v3678_v2, %v4782_v58 }
 0x74e   :  { %v1977_v6 = vadd.f32 %v1976_v20, %v5024_v56 }
 0x750   :  { %3679 = vtanh.f32 %v1977_v6 }
 0x75a   :  { %v3680_v41 = vpop.eup %3679 }
 0x75b   :  { %v1980_v47 = vmul.f32 %v3680_v41, %v1979_v32 }
 0x75d   :  { %v4920_v23 = vadd.f32 %v1981_v38, %v1980_v47 }
 0x75f   :  { %2121 = vmatmul.mubr.f32.vlgmr.msra.gmra.mrb[14].mxu0 %v4920_v23  ;;  %2970 = vmatmul.mubr.f32.vlgmr.msra.gmra.mrb[38].mxu1 %v4920_v23 }
 0x760   :  { %3531 = vmatpush3.bf16.msra.mxu0 %v3528_v49  ;;  %3004 = vmatprep.mubr.f32.mxu0 %v4366_v60  ;;  %v2237_v60 = vld [vmem:[%s5007_s5 + $0x48] sm:$0xff] }
 0x761   :  { %3533 = vmatprep.subr.bf16.mxu0 %v3532_v19  ;;  %v3544_v48 = vpack.c.bf16 %v2237_v60, %v2236_v15 }
 0x764   :  { %3535 = vmatpush3.bf16.msra.mxu0 %v3532_v19 }
 0x765   :  { %3537 = vmatprep.subr.bf16.mxu0 %v3536_v29 }
 0x768   :  { %3539 = vmatpush3.bf16.msra.mxu0 %v3536_v29 }
 0x769   :  { %3541 = vmatprep.subr.bf16.mxu0 %v3540_v9 }
 0x76c   :  { %3543 = vmatpush3.bf16.msra.mxu0 %v3540_v9 }
 0x76d   :  { %3545 = vmatprep.subr.bf16.mxu0 %v3544_v48 }
 0x770   :  { %3547 = vmatpush3.bf16.msra.mxu0 %v3544_v48 }
 0x771   :  { %3549 = vmatprep.subr.bf16.mxu0 %v3548_v14 }
 0x774   :  { %3551 = vmatpush3.bf16.msra.mxu0 %v3548_v14 }
 0x775   :  { %3553 = vmatprep.subr.bf16.mxu0 %v3552_v8 }
 0x778   :  { %3555 = vmatpush3.bf16.msra.mxu0 %v3552_v8 }
 0x779   :  { %3557 = vmatprep.subr.bf16.mxu0 %v3556_v0 }
 0x77c   :  { %3559 = vmatpush3.bf16.msra.mxu0 %v3556_v0 }
 0x77f   :  { %3005 = vmatmul.mubr.f32.vlgmr.msra.gmra.mrb[16].mxu0 %v4410_v5 }
 0x780   :  { %3007 = vmatprep.mubr.f32.mxu0 %v4584_v16 }
 0x783   :  { %3008 = vmatmul.mubr.f32.gmra.mrb[18].mxu0 %v4693_v17  ;;  %v5026_v17 = vld [vmem:[#allocation6_spill] sm:$0xff] }
 0x784   :  { %3010 = vmatprep.mubr.f32.mxu0 %v4738_v26 }
 0x787   :  { %3011 = vmatmul.mubr.f32.gmra.mrb[20].mxu0 %v4782_v58 }
 0x788   :  { %3013 = vmatprep.mubr.f32.mxu0 %v4920_v23 }
 0x832   :  { %v2122_v55 = vpop.f32.mrb[14].mxu0  ;;  %v2193_v7 = vpop.f32.mrb[38].mxu1 }
 0x833   :  { %v3604_v5 = vadd.f32 %v5025_v36, %v2122_v55  ;;  %v2194_v50 = vadd.f32 %v2193_v7, %v2052_v35  ;;  %v2124_v16 = vpop.f32.mrb[15].mxu0  ;;  %v2971_v51 = vpop.f32.mrb[39].mxu1 }
 0x834   :  { %v3607_v24 = vadd.f32 %v5026_v17, %v2124_v16 }
 0x835   :  { %v2461_v26 = vmul.f32 -1.442695, %v3604_v5 }
 0x836   :  { %v2462_v58 = vmul.f32 -1.442695, %v3607_v24 }
 0x837   :  { %3681 = vpow2.f32 %v2461_v26 }
 0x838   :  { %3683 = vpow2.f32 %v2462_v58 }
 0x841   :  { %v3682_v31 = vpop.eup %3681 }
 0x842   :  { %v2201_v63 = vadd.f32 1.0, %v3682_v31  ;;  %v3684_v49 = vpop.eup %3683 }
 0x843   :  { %v2208_v28 = vadd.f32 1.0, %v3684_v49 }
 0x844   :  { %3685 = vrcp.f32 %v2201_v63 }
 0x845   :  { %3687 = vrcp.f32 %v2208_v28 }
 0x84e   :  { %v3686_v34 = vpop.eup %3685 }
 0x84f   :  { %v2211_v39 = vmul.f32 %v3686_v34, %v2194_v50  ;;  %v3688_v43 = vpop.eup %3687 }
 0x850   :  { %v2214_v20 = vsub.f32 1.0, %v3688_v43  ;;  %v2216_v2 = vmul.f32 %v3688_v43, %v4920_v23 }
 0x851   :  { %v2212_v33 = vadd.f32 %v2211_v39, %v5027_v46 }
 0x852   :  { %v3006_v12 = vpop.f32.mrb[16].mxu0 }
 0x853   :  { %3689 = vtanh.f32 %v2212_v33  ;;  %v2323_v57 = vadd.f32 %v3006_v12, %v2463_v30  ;;  %v2317_v54 = vpop.f32.mrb[17].mxu0 }
 0x854   :  { %v2318_v44 = vadd.f32 %v2463_v30, %v2317_v54 }
 0x855   :  { %2358 = vmax.xlane.f32.xlu0 %v2323_v57 }
 0x856   :  { %v3009_v37 = vpop.f32.mrb[18].mxu0 }
 0x857   :  { %v2333_v10 = vadd.f32 %v3009_v37, %v2463_v30  ;;  %v2327_v52 = vpop.f32.mrb[19].mxu0 }
 0x858   :  { %v2328_v4 = vadd.f32 %v2463_v30, %v2327_v52 }
 0x859   :  { %2362 = vmax.xlane.f32.xlu1 %v2333_v10  ;;  %2356 = vmax.xlane.f32.xlu0 %v2318_v44 }
 0x85a   :  { %v3012_v42 = vpop.f32.mrb[20].mxu0 }
 0x85b   :  { %v2337_v21 = vpop.f32.mrb[21].mxu0  ;;  %v2343_v32 = vadd.f32 %v3012_v42, %v2463_v30 }
 0x85c   :  { %v2338_v3 = vadd.f32 %v2463_v30, %v2337_v21 }
 0x85d   :  { %v3690_v56 = vpop.eup %3689  ;;  %2360 = vmax.xlane.f32.xlu1 %v2328_v4 }
 0x85e   :  { %2364 = vmax.xlane.f32.xlu0 %v2338_v3  ;;  %v2215_v6 = vmul.f32 %v3690_v56, %v2214_v20 }
 0x860   :  { %v2217_v41 = vadd.f32 %v2216_v2, %v2215_v6 }
 0x861   :  { %2366 = vmax.xlane.f32.xlu1 %v2343_v32 }
 0x862   :  { %3014 = vmatmul.mubr.f32.gmra.mrb[22].mxu0 %v2217_v41 }
 0x8e2   :  { %v2359_v53 = vpop.xlane.xlu0 %2358 }
 0x8e3   :  { %v2373_v19 = vsub.f32 %v2323_v57, %v2359_v53 }
 0x8e5   :  { %v2382_v45 = vmul.f32 1.442695, %v2373_v19 }
 0x8e6   :  { %v2363_v27 = vpop.xlane.xlu1 %2362  ;;  %v2357_v47 = vpop.xlane.xlu0 %2356 }
 0x8e7   :  { %v2372_v13 = vsub.f32 %v2318_v44, %v2357_v47  ;;  %v2375_v29 = vsub.f32 %v2333_v10, %v2363_v27  ;;  %3691 = vpow2.f32 %v2382_v45 }
 0x8e9   :  { %v2380_v11 = vmul.f32 1.442695, %v2372_v13  ;;  %v2386_v60 = vmul.f32 1.442695, %v2375_v29 }
 0x8ea   :  { %v2361_v38 = vpop.xlane.xlu1 %2360 }
 0x8eb   :  { %v2374_v61 = vsub.f32 %v2328_v4, %v2361_v38  ;;  %v2365_v15 = vpop.xlane.xlu0 %2364  ;;  %3693 = vpow2.f32 %v2380_v11 }
 0x8ec   :  { %v2376_v25 = vsub.f32 %v2338_v3, %v2365_v15  ;;  %3695 = vpow2.f32 %v2386_v60 }
 0x8ed   :  { %v2384_v23 = vmul.f32 1.442695, %v2374_v61 }
 0x8ee   :  { %v2367_v9 = vpop.xlane.xlu1 %2366  ;;  %v2388_v22 = vmul.f32 1.442695, %v2376_v25 }
 0x8ef   :  { %v2377_v48 = vsub.f32 %v2343_v32, %v2367_v9  ;;  %3697 = vpow2.f32 %v2384_v23 }
 0x8f1   :  { %v2390_v59 = vmul.f32 1.442695, %v2377_v48  ;;  %v3692_v62 = vpop.eup %3691 }
 0x8f3   :  { %3699 = vpow2.f32 %v2390_v59 }
 0x8f4   :  { %3701 = vpow2.f32 %v2388_v22 }
 0x8f5   :  { %v3694_v0 = vpop.eup %3693 }
 0x8f6   :  { %v3696_v18 = vpop.eup %3695 }
 0x8f9   :  { %v3698_v35 = vpop.eup %3697 }
 0x8fd   :  { %v3700_v55 = vpop.eup %3699 }
 0x8fe   :  { %v3702_v7 = vpop.eup %3701 }
 0x935   :  { %v3015_v14 = vpop.f32.mrb[22].mxu0 }
 0x936   :  { %v2353_v40 = vadd.f32 %v3015_v14, %v2463_v30  ;;  %v2347_v8 = vpop.f32.mrb[23].mxu0 }
 0x937   :  { %v2348_v1 = vadd.f32 %v2463_v30, %v2347_v8 }
 0x938   :  { %2370 = vmax.xlane.f32.xlu1 %v2353_v40 }
 0x939   :  { %2368 = vmax.xlane.f32.xlu0 %v2348_v1 }
 0x93c   :  { %2398 = vadd.xlane.f32.xlu1 %v3692_v62 }
 0x93d   :  { %2396 = vadd.xlane.f32.xlu0 %v3694_v0 }
 0x940   :  { %2402 = vadd.xlane.f32.xlu1 %v3696_v18 }
 0x941   :  { %2400 = vadd.xlane.f32.xlu0 %v3698_v35 }
 0x944   :  { %2406 = vadd.xlane.f32.xlu1 %v3700_v55 }
 0x945   :  { %2404 = vadd.xlane.f32.xlu0 %v3702_v7 }
 0x9c5   :  { %v2371_v36 = vpop.xlane.xlu1 %2370 }
 0x9c6   :  { %v2379_v5 = vsub.f32 %v2353_v40, %v2371_v36  ;;  %v2369_v50 = vpop.xlane.xlu0 %2368 }
 0x9c7   :  { %v2378_v16 = vsub.f32 %v2348_v1, %v2369_v50 }
 0x9c8   :  { %v2394_v51 = vmul.f32 1.442695, %v2379_v5 }
 0x9c9   :  { %v2392_v17 = vmul.f32 1.442695, %v2378_v16  ;;  %v2399_v24 = vpop.xlane.xlu1 %2398 }
 0x9ca   :  { %3703 = vpow2.f32 %v2394_v51  ;;  %v2397_v26 = vpop.xlane.xlu0 %2396 }
 0x9cb   :  { %3705 = vpow2.f32 %v2392_v17 }
 0x9cc   :  { %3707 = vrcp.f32 %v2399_v24 }
 0x9cd   :  { %3709 = vrcp.f32 %v2397_v26  ;;  %v2403_v58 = vpop.xlane.xlu1 %2402 }
 0x9ce   :  { %3711 = vrcp.f32 %v2403_v58  ;;  %v2401_v31 = vpop.xlane.xlu0 %2400 }
 0x9cf   :  { %3713 = vrcp.f32 %v2401_v31 }
 0x9d1   :  { %v2407_v63 = vpop.xlane.xlu1 %2406 }
 0x9d2   :  { %3715 = vrcp.f32 %v2407_v63  ;;  %v2405_v49 = vpop.xlane.xlu0 %2404 }
 0x9d3   :  { %3717 = vrcp.f32 %v2405_v49 }
 0x9d4   :  { %v3704_v28 = vpop.eup %3703 }
 0x9d5   :  { %v3706_v34 = vpop.eup %3705  ;;  %2410 = vadd.xlane.f32.xlu1 %v3704_v28 }
 0x9d6   :  { %v3708_v39 = vpop.eup %3707  ;;  %2408 = vadd.xlane.f32.xlu0 %v3706_v34 }
 0x9d7   :  { %v3710_v30 = vpop.eup %3709  ;;  %v2421_v46 = vmul.f32 %v3708_v39, %v3692_v62 }
 0x9d8   :  { %v3712_v33 = vpop.eup %3711  ;;  %v2420_v12 = vmul.f32 %v3710_v30, %v3694_v0 }
 0x9d9   :  { %v3714_v57 = vpop.eup %3713  ;;  %2429 = vst [vmem:[%s5009_s7 + $0x8] sm:$0xff] %v2421_v46  ;;  %v2423_v54 = vmul.f32 %v3712_v33, %v3696_v18 }
 0x9da   :  { %2428 = vst [vmem:[%s5009_s7] sm:$0xff] %v2420_v12  ;;  %v2422_v37 = vmul.f32 %v3714_v57, %v3698_v35 }
 0x9db   :  { %2431 = vst [vmem:[%s5009_s7 + $0x18] sm:$0xff] %v2423_v54 }
 0x9dc   :  { %v3716_v44 = vpop.eup %3715  ;;  %2430 = vst [vmem:[%s5009_s7 + $0x10] sm:$0xff] %v2422_v37 }
 0x9dd   :  { %v3718_v10 = vpop.eup %3717  ;;  %v2425_v52 = vmul.f32 %v3716_v44, %v3700_v55 }
 0x9de   :  { %v2424_v43 = vmul.f32 %v3718_v10, %v3702_v7 }
 0x9df   :  { %2433 = vst [vmem:[%s5009_s7 + $0x28] sm:$0xff] %v2425_v52 }
 0x9e0   :  { %2432 = vst [vmem:[%s5009_s7 + $0x20] sm:$0xff] %v2424_v43 }
 0xa62   :  { %v2411_v42 = vpop.xlane.xlu1 %2410 }
 0xa63   :  { %3719 = vrcp.f32 %v2411_v42  ;;  %v2409_v4 = vpop.xlane.xlu0 %2408 }
 0xa64   :  { %3721 = vrcp.f32 %v2409_v4 }
 0xa6d   :  { %v3720_v21 = vpop.eup %3719 }
 0xa6e   :  { %v3722_v3 = vpop.eup %3721  ;;  %v2427_v20 = vmul.f32 %v3720_v21, %v3704_v28 }
 0xa6f   :  { %v2426_v56 = vmul.f32 %v3722_v3, %v3706_v34 }
 0xa70   :  { %2435 = vst [vmem:[%s5009_s7 + $0x38] sm:$0xff] %v2427_v20 }
 0xa71   :  { %2434 = vst [vmem:[%s5009_s7 + $0x30] sm:$0xff] %v2426_v56 }

</bundles_post_ra>
